<compile_context>
chip_gen: v7x
topology: tpu7x:2x2x1
jax: 0.10.0
libtpu: 0.0.40
codegen_flags: <defaults>
</compile_context>

<pallas_src>
import functools

import jax
import jax.numpy as jnp
from jax import lax
from jax.experimental import pallas as pl
from jax.experimental.pallas import tpu as pltpu


# ------------------------- VMEM budget (per generation) ----------------------

@functools.lru_cache(maxsize=None)
def _vmem_limit_bytes():
    """Scoped-VMEM limit: ~half the physical VMEM of the current chip."""
    try:
        cap = getattr(pltpu.get_tpu_info(), "vmem_capacity_bytes", None)
        if cap:
            # 64 MiB on 128-MiB v5e/v6e, 32 MiB on 64-MiB v7x.
            return int(min(max(cap // 2, 32 * 1024 * 1024), 96 * 1024 * 1024))
    except Exception:
        pass
    return 40 * 1024 * 1024                      # safe default (all gens)


def _tile_bytes(rows, cols, itemsize):
    """VMEM bytes of a (rows, cols) tile including (sublane, lane) padding."""
    sub = 32 // itemsize
    return (-(-rows // sub) * sub) * (-(-cols // 128) * 128) * itemsize


def _choose_phase_group(s2, hwq, cin, nt2, tc, l_rows, out_isz, has_bn):
    """Largest number of stride phases kept VMEM-resident per grid step."""
    budget = int(0.6 * _vmem_limit_bytes())
    best_fit = None
    best_any, best_any_need = None, None
    for pg in sorted((d for d in range(1, s2 + 1) if s2 % d == 0),
                     reverse=True):
        n_steps = s2 // pg
        need = 2 * (_tile_bytes(hwq, pg * cin, 2)             # x (dbl-buffered)
                    + nt2 * _tile_bytes(pg * cin, tc, 2)      # weights
                    + _tile_bytes(l_rows, tc, out_isz)        # y block
                    + (_tile_bytes(2, tc, 4) if has_bn else 0))
        need += _tile_bytes(l_rows, tc, 4)                    # live f32 acc
        if n_steps > 1:
            need += _tile_bytes(l_rows, tc, 4)                # acc scratch
        if need <= budget and best_fit is None:
            best_fit = pg
        if best_any is None or need < best_any_need:
            best_any, best_any_need = pg, need
    return best_fit if best_fit is not None else best_any


# ------------------------------ Pallas kernel --------------------------------

def _conv_kernel(x_ref, w_ref, b_ref, *refs, offsets, wq, wo, has_bn, act,
                 neg, n_steps):
    """Implicit-GEMM 4x4 conv over channel-concatenated stride-phase planes.

    x_ref    : (HWq, K)        bf16  one phase-group plane of one image
    w_ref    : (NT2, K, TC)    bf16  per-tap weights, K = pg*Cin
    b_ref    : (1, TC)         f32
    y_ref    : (L, TC)               conv output rows (junk cols included)
    stats_ref: (2, TC)         f32   [sum, sum_sq] over valid rows (BN only)
    acc_ref  : (L, TC)         f32   scratch, only when n_steps > 1
    """
    refs = list(refs)
    y_ref = refs.pop(0)
    stats_ref = refs.pop(0) if has_bn else None
    acc_ref = refs.pop(0) if n_steps > 1 else None
    L = y_ref.shape[0]

    def tap_sum():
        acc = None
        for t, off in enumerate(offsets):        # static unroll over taps
            xs = x_ref[pl.ds(off, L), :]         # (L, K) bf16, static slice
            part = jnp.dot(xs, w_ref[t], preferred_element_type=jnp.float32)
            acc = part if acc is None else acc + part
        return acc

    def epilogue(total):
        yv = total + b_ref[...]                  # (L, TC) f32
        if has_bn:
            # mask junk columns (flat pos % Wq >= Wo) out of the BN statistics
            col = lax.broadcasted_iota(jnp.int32, (L, 1), 0) % wq
            valid = (col < wo).astype(jnp.float32)
            ym = yv * valid
            stats_ref[0:1, :] = jnp.sum(ym, axis=0, keepdims=True)
            stats_ref[1:2, :] = jnp.sum(ym * yv, axis=0, keepdims=True)
            y_ref[...] = yv.astype(y_ref.dtype)  # pre-norm, pre-activation
        else:
            out = jnp.where(yv >= 0.0, yv, neg * yv) if act else yv
            y_ref[...] = out.astype(y_ref.dtype)

    if n_steps == 1:
        # all phases resident: no accumulator round trip through VMEM scratch
        epilogue(tap_sum())
    else:
        q = pl.program_id(2)

        @pl.when(q == 0)
        def _():
            acc_ref[...] = jnp.zeros_like(acc_ref)

        acc_ref[...] += tap_sum()

        @pl.when(q == n_steps - 1)
        def _():
            epilogue(acc_ref[...])


# --------------------------- pallas_call wrapper ------------------------------

def _conv_pallas(xflat, wg, bias, *, ho, wo, wq, nta, has_bn, act, neg,
                 out_dtype, tc):
    n_steps, N, HWq, K = xflat.shape
    _, NT2, _, Cp = wg.shape
    n_ct = Cp // tc
    L = (ho - 1) * wq + wo                       # flat output rows (incl junk)
    offsets = tuple(a * wq + b for a in range(nta) for b in range(nta))

    kern = functools.partial(_conv_kernel, offsets=offsets, wq=wq, wo=wo,
                             has_bn=has_bn, act=act, neg=neg, n_steps=n_steps)

    out_shape = [jax.ShapeDtypeStruct((N, L, Cp), out_dtype)]
    out_specs = [pl.BlockSpec((None, L, tc), lambda n, c, q: (n, 0, c))]
    if has_bn:
        out_shape.append(jax.ShapeDtypeStruct((N, 2, Cp), jnp.float32))
        out_specs.append(pl.BlockSpec((None, 2, tc), lambda n, c, q: (n, 0, c)))
    scratch = [pltpu.VMEM((L, tc), jnp.float32)] if n_steps > 1 else []

    out_isz = jnp.dtype(out_dtype).itemsize
    flops = 2 * N * ho * wo * (NT2 * n_steps * K) * Cp
    x_passes = n_ct if n_steps > 1 else 1        # x re-streamed per Cout tile
    bytes_accessed = (xflat.size * 2 * x_passes + wg.size * 2 * N
                      + N * L * Cp * out_isz
                      + (N * 2 * Cp * 4 if has_bn else 0))

    return pl.pallas_call(
        kern,
        grid_spec=pltpu.PrefetchScalarGridSpec(
            num_scalar_prefetch=0,
            grid=(N, n_ct, n_steps),             # reduction (phase groups) last
            in_specs=[
                pl.BlockSpec((None, None, HWq, K),
                             lambda n, c, q: (q, n, 0, 0)),
                pl.BlockSpec((None, NT2, K, tc),
                             lambda n, c, q: (q, 0, 0, c)),
                pl.BlockSpec((1, tc), lambda n, c, q: (0, c)),
            ],
            out_specs=out_specs,
            scratch_shapes=scratch,
        ),
        out_shape=out_shape,
        compiler_params=pltpu.CompilerParams(
            dimension_semantics=("parallel", "parallel", "arbitrary"),
            vmem_limit_bytes=_vmem_limit_bytes()),
        cost_estimate=pl.CostEstimate(flops=int(flops), transcendentals=0,
                                      bytes_accessed=int(bytes_accessed)),
    )(xflat, wg, bias)


# --------------------------- layer glue (plain JAX) --------------------------

def _phase_planes(x_nhwc, s, pad, pg):
    """Pad x and regroup into phase-group planes.

    Returns (s*s//pg, N, Hq*Wq, pg*C): within each group of pg stride phases
    the phase planes are concatenated along the channel axis -- a pure
    relayout (no duplication), so each conv tap contracts over pg*C channels.
    """
    N, H, W, C = x_nhwc.shape
    xp = jnp.pad(x_nhwc, ((0, 0), (pad, pad), (pad, pad), (0, 0)))
    Hp, Wp = H + 2 * pad, W + 2 * pad
    Hq, Wq = -(-Hp // s), -(-Wp // s)
    xp = jnp.pad(xp, ((0, 0), (0, Hq * s - Hp), (0, Wq * s - Wp), (0, 0)))
    planes = [xp[:, pr::s, pc::s, :] for pr in range(s) for pc in range(s)]
    groups = [jnp.concatenate(planes[g * pg:(g + 1) * pg], axis=-1)
              for g in range(len(planes) // pg)]
    xg = jnp.stack(groups, axis=0)               # (n_steps, N, Hq, Wq, pg*C)
    return xg.reshape(len(groups), N, Hq * Wq, pg * C)


def _reorder_weights(w, s, pg, cpad):
    """(Cout,Cin,kh,kw) -> (s*s//pg, (kh/s)*(kw/s), pg*Cin, Cout+cpad)."""
    Cout, Cin, kh, kw = w.shape
    nta = kh // s
    wt = jnp.transpose(w, (2, 3, 1, 0))          # (kh, kw, Cin, Cout)
    if cpad:
        wt = jnp.pad(wt, ((0, 0), (0, 0), (0, 0), (0, cpad)))
    phases = [(pr, pc) for pr in range(s) for pc in range(s)]
    steps = []
    for g in range(len(phases) // pg):
        grp = phases[g * pg:(g + 1) * pg]
        taps = []
        for a in range(nta):
            for b in range(nta):
                taps.append(jnp.concatenate(
                    [wt[pr + s * a, pc + s * b] for (pr, pc) in grp], axis=0))
        steps.append(jnp.stack(taps, axis=0))    # (NT2, pg*Cin, Cp)
    return jnp.stack(steps, axis=0)              # (n_steps, NT2, pg*Cin, Cp)


def conv_bn_lrelu_block(x_nhwc, w, b, bn, *, stride, act, neg=0.2,
                        final=False):
    """Conv2d(4x4, pad=1) (+BatchNorm2d training stats) (+LeakyReLU(0.2))."""
    x_nhwc = x_nhwc.astype(jnp.bfloat16)
    N, H, W_, Cin = x_nhwc.shape
    Cout = w.shape[0]
    k, pad, s = 4, 1, stride
    Ho = (H + 2 * pad - k) // s + 1
    Wo = (W_ + 2 * pad - k) // s + 1
    nta = k // s
    nt2 = nta * nta
    s2 = s * s
    Hq, Wq = -(-(H + 2 * pad) // s), -(-(W_ + 2 * pad) // s)
    HWq = Hq * Wq
    L = (Ho - 1) * Wq + Wo

    # lane-dense stores on *every* layer: pad Cout to a multiple of 128
    cpad = (-Cout) % 128
    Cp = Cout + cpad
    TC = next(t for t in (512, 256, 128) if Cp % t == 0)
    out_dtype = jnp.float32 if final else jnp.bfloat16
    has_bn = bn is not None

    pg = _choose_phase_group(s2, HWq, Cin, nt2, TC, L,
                             jnp.dtype(out_dtype).itemsize, has_bn)

    wg = _reorder_weights(w, s, pg, cpad).astype(jnp.bfloat16)
    bias = b if b is not None else jnp.zeros((Cout,), jnp.float32)
    bias = jnp.pad(bias, (0, cpad)).reshape(1, Cp).astype(jnp.float32)
    xflat = _phase_planes(x_nhwc, s, pad, pg)    # (n_steps, N, HWq, pg*Cin)

    outs = _conv_pallas(xflat, wg, bias, ho=Ho, wo=Wo, wq=Wq, nta=nta,
                        has_bn=has_bn, act=(act and not has_bn), neg=neg,
                        out_dtype=out_dtype, tc=TC)
    y = outs[0][..., :Cout]                      # drop padded channels

    if has_bn:
        # PyTorch BatchNorm2d training mode: biased batch stats over (N,H,W),
        # eps=1e-5, affine.  scale/shift come from the fused in-kernel sums
        # and are applied here in plain jnp so XLA fuses them into the
        # relayout below (no standalone BN pass over HBM).  Note: the
        # normalization is applied to the bf16-rounded conv output, so a
        # small drift vs an all-f32 reference is expected.
        stats = outs[1][..., :Cout]              # (N, 2, Cout) f32
        gamma, beta = bn
        cnt = jnp.float32(N * Ho * Wo)
        mean = jnp.sum(stats[:, 0, :], axis=0) / cnt
        var = jnp.maximum(jnp.sum(stats[:, 1, :], axis=0) / cnt - mean * mean,
                          0.0)
        inv = lax.rsqrt(var + 1e-5)
        scale = (gamma * inv).astype(jnp.float32)
        shift = (beta - mean * gamma * inv).astype(jnp.float32)
        z = y.astype(jnp.float32) * scale + shift
        y = jnp.where(z >= 0.0, z, neg * z).astype(jnp.bfloat16)

    # un-flatten rows, drop junk columns (w >= Wo); fused by XLA with the
    # BN/LeakyReLU above and the next layer's phase-plane relayout.
    y = jnp.pad(y, ((0, 0), (0, Ho * Wq - L), (0, 0)))
    y = y.reshape(N, Ho, Wq, Cout)[:, :, :Wo, :]
    return y


# --------------------------- PatchDiscriminator ------------------------------

def build_patch_discriminator_config(num_in_ch, num_feat=64, num_layers=3,
                                     max_nf_mult=8):
    # Mirrors PatchDiscriminator.__init__ with norm_type='batch',
    # use_sigmoid=False, use_sn=False (use_bias=False for BN'd convs).
    cfgs = [dict(cin=num_in_ch, cout=num_feat, stride=2, bias=True,
                 bn=False, act=True, final=False)]
    nf_mult = 1
    for n in range(1, num_layers):
        nf_prev, nf_mult = nf_mult, min(2 ** n, max_nf_mult)
        cfgs.append(dict(cin=num_feat * nf_prev, cout=num_feat * nf_mult,
                         stride=2, bias=False, bn=True, act=True, final=False))
    nf_prev, nf_mult = nf_mult, min(2 ** num_layers, max_nf_mult)
    cfgs.append(dict(cin=num_feat * nf_prev, cout=num_feat * nf_mult,
                     stride=1, bias=False, bn=True, act=True, final=False))
    cfgs.append(dict(cin=num_feat * nf_mult, cout=1, stride=1, bias=True,
                     bn=False, act=False, final=True))
    return cfgs


def init_patch_discriminator_params(key, cfgs, kw=4):
    params = []
    for cfg in cfgs:
        key, kw_key, kb_key = jax.random.split(key, 3)
        w = 0.02 * jax.random.normal(
            kw_key, (cfg["cout"], cfg["cin"], kw, kw), jnp.float32)
        b = (0.01 * jax.random.normal(kb_key, (cfg["cout"],), jnp.float32)
             if cfg["bias"] else None)
        if cfg["bn"]:
            # PyTorch BatchNorm2d(affine=True) default init: gamma=1, beta=0.
            bn = (jnp.ones((cfg["cout"],), jnp.float32),
                  jnp.zeros((cfg["cout"],), jnp.float32))
        else:
            bn = None
        params.append(dict(w=w, b=b, bn=bn))
    return params


def patch_discriminator_forward(params, cfgs, x_nchw):
    # NCHW -> NHWC once at the boundary; NHWC bf16 carried end-to-end.
    y = jnp.transpose(x_nchw, (0, 2, 3, 1)).astype(jnp.bfloat16)
    for p, cfg in zip(params, cfgs):
        y = conv_bn_lrelu_block(y, p["w"], p["b"], p["bn"],
                                stride=cfg["stride"], act=cfg["act"],
                                final=cfg["final"])
    return jnp.transpose(y, (0, 3, 1, 2)).astype(jnp.float32)   # back to NCHW


# --------------------------- main --------------------------------------------

if __name__ == "__main__":
    # Small config: num_in_ch=4, num_feat=8, num_layers=3, spatial 32x32
    # (32 -> 16 -> 8 -> 4 -> 3 -> 2 so every 4x4 conv stays valid).
    num_in_ch, num_feat, num_layers, max_nf_mult = 4, 8, 3, 8
    N, H, W = 2, 32, 32

    key = jax.random.PRNGKey(0)
    key_x, key_p = jax.random.split(key)
    x = jax.random.normal(key_x, (N, num_in_ch, H, W), jnp.float32)

    cfgs = build_patch_discriminator_config(num_in_ch, num_feat, num_layers,
                                            max_nf_mult)
    params = init_patch_discriminator_params(key_p, cfgs)

    out = patch_discriminator_forward(params, cfgs, x)
    out = jax.block_until_ready(out)

    assert out.shape == (N, 1, 2, 2), out.shape
    assert bool(jnp.all(jnp.isfinite(out)))
    print("KERNEL_OK")
</pallas_src>

<mosaic_0001>
module attributes {stable_mosaic.version = 11 : i64} {
  func.func @_conv_kernel(%arg0: i32, %arg1: i32, %arg2: i32, %arg3: memref<1x1x289x16xbf16, #tpu.memory_space<vmem>>, %arg4: memref<1x4x16x128xbf16, #tpu.memory_space<vmem>>, %arg5: memref<1x128xf32, #tpu.memory_space<vmem>>, %arg6: memref<1x271x128xbf16, #tpu.memory_space<vmem>>) attributes {dimension_semantics = [#tpu.dimension_semantics<parallel>, #tpu.dimension_semantics<parallel>, #tpu.dimension_semantics<arbitrary>], iteration_bounds = array<i64: 2, 1, 1>, scalar_prefetch = 0 : i64, scratch_operands = 0 : i64, tpu.core_type = #tpu.core_type<tc>, window_params = [{transform_indices = @transform_0, window_bounds = array<i64: 1, 1, 289, 16>}, {transform_indices = @transform_1, window_bounds = array<i64: 1, 4, 16, 128>}, {transform_indices = @transform_2, window_bounds = array<i64: 1, 128>}, {transform_indices = @transform_3, window_bounds = array<i64: 1, 271, 128>}]} {
    %c0 = arith.constant 0 : index
    %c0_0 = arith.constant 0 : index
    %c0_1 = arith.constant 0 : index
    %c0_2 = arith.constant 0 : index
    %0 = vector.load %arg3[%c0, %c0_0, %c0_1, %c0_2] : memref<1x1x289x16xbf16, #tpu.memory_space<vmem>>, vector<1x1x271x16xbf16>
    %1 = vector.shape_cast %0 : vector<1x1x271x16xbf16> to vector<271x16xbf16>
    %c0_3 = arith.constant 0 : index
    %c0_4 = arith.constant 0 : index
    %c0_5 = arith.constant 0 : index
    %c0_6 = arith.constant 0 : index
    %2 = vector.load %arg4[%c0_3, %c0_4, %c0_5, %c0_6] : memref<1x4x16x128xbf16, #tpu.memory_space<vmem>>, vector<1x1x16x128xbf16>
    %3 = vector.shape_cast %2 : vector<1x1x16x128xbf16> to vector<16x128xbf16>
    %cst = arith.constant dense<0.000000e+00> : vector<271x128xf32>
    %4 = tpu.matmul %1, %3, %cst {dimension_numbers = #tpu.dot_dimension_numbers<[1], [0], [0], [1], [0, 0, 1, 1], [], []>} : vector<271x16xbf16>, vector<16x128xbf16>, vector<271x128xf32> -> vector<271x128xf32>
    %c0_7 = arith.constant 0 : index
    %c0_8 = arith.constant 0 : index
    %c1 = arith.constant 1 : index
    %c0_9 = arith.constant 0 : index
    %5 = vector.load %arg3[%c0_7, %c0_8, %c1, %c0_9] : memref<1x1x289x16xbf16, #tpu.memory_space<vmem>>, vector<1x1x271x16xbf16>
    %6 = vector.shape_cast %5 : vector<1x1x271x16xbf16> to vector<271x16xbf16>
    %c0_10 = arith.constant 0 : index
    %c1_11 = arith.constant 1 : index
    %c0_12 = arith.constant 0 : index
    %c0_13 = arith.constant 0 : index
    %7 = vector.load %arg4[%c0_10, %c1_11, %c0_12, %c0_13] : memref<1x4x16x128xbf16, #tpu.memory_space<vmem>>, vector<1x1x16x128xbf16>
    %8 = vector.shape_cast %7 : vector<1x1x16x128xbf16> to vector<16x128xbf16>
    %cst_14 = arith.constant dense<0.000000e+00> : vector<271x128xf32>
    %9 = tpu.matmul %6, %8, %cst_14 {dimension_numbers = #tpu.dot_dimension_numbers<[1], [0], [0], [1], [0, 0, 1, 1], [], []>} : vector<271x16xbf16>, vector<16x128xbf16>, vector<271x128xf32> -> vector<271x128xf32>
    %10 = arith.addf %4, %9 : vector<271x128xf32>
    %c0_15 = arith.constant 0 : index
    %c0_16 = arith.constant 0 : index
    %c17 = arith.constant 17 : index
    %c0_17 = arith.constant 0 : index
    %11 = vector.load %arg3[%c0_15, %c0_16, %c17, %c0_17] : memref<1x1x289x16xbf16, #tpu.memory_space<vmem>>, vector<1x1x271x16xbf16>
    %12 = vector.shape_cast %11 : vector<1x1x271x16xbf16> to vector<271x16xbf16>
    %c0_18 = arith.constant 0 : index
    %c2 = arith.constant 2 : index
    %c0_19 = arith.constant 0 : index
    %c0_20 = arith.constant 0 : index
    %13 = vector.load %arg4[%c0_18, %c2, %c0_19, %c0_20] : memref<1x4x16x128xbf16, #tpu.memory_space<vmem>>, vector<1x1x16x128xbf16>
    %14 = vector.shape_cast %13 : vector<1x1x16x128xbf16> to vector<16x128xbf16>
    %cst_21 = arith.constant dense<0.000000e+00> : vector<271x128xf32>
    %15 = tpu.matmul %12, %14, %cst_21 {dimension_numbers = #tpu.dot_dimension_numbers<[1], [0], [0], [1], [0, 0, 1, 1], [], []>} : vector<271x16xbf16>, vector<16x128xbf16>, vector<271x128xf32> -> vector<271x128xf32>
    %16 = arith.addf %10, %15 : vector<271x128xf32>
    %c0_22 = arith.constant 0 : index
    %c0_23 = arith.constant 0 : index
    %c18 = arith.constant 18 : index
    %c0_24 = arith.constant 0 : index
    %17 = vector.load %arg3[%c0_22, %c0_23, %c18, %c0_24] : memref<1x1x289x16xbf16, #tpu.memory_space<vmem>>, vector<1x1x271x16xbf16>
    %18 = vector.shape_cast %17 : vector<1x1x271x16xbf16> to vector<271x16xbf16>
    %c0_25 = arith.constant 0 : index
    %c3 = arith.constant 3 : index
    %c0_26 = arith.constant 0 : index
    %c0_27 = arith.constant 0 : index
    %19 = vector.load %arg4[%c0_25, %c3, %c0_26, %c0_27] : memref<1x4x16x128xbf16, #tpu.memory_space<vmem>>, vector<1x1x16x128xbf16>
    %20 = vector.shape_cast %19 : vector<1x1x16x128xbf16> to vector<16x128xbf16>
    %cst_28 = arith.constant dense<0.000000e+00> : vector<271x128xf32>
    %21 = tpu.matmul %18, %20, %cst_28 {dimension_numbers = #tpu.dot_dimension_numbers<[1], [0], [0], [1], [0, 0, 1, 1], [], []>} : vector<271x16xbf16>, vector<16x128xbf16>, vector<271x128xf32> -> vector<271x128xf32>
    %22 = arith.addf %16, %21 : vector<271x128xf32>
    %c0_29 = arith.constant 0 : index
    %c0_30 = arith.constant 0 : index
    %23 = vector.load %arg5[%c0_29, %c0_30] : memref<1x128xf32, #tpu.memory_space<vmem>>, vector<1x128xf32>
    %24 = vector.broadcast %23 : vector<1x128xf32> to vector<271x128xf32>
    %25 = arith.addf %22, %24 : vector<271x128xf32>
    %cst_31 = arith.constant 0.000000e+00 : f32
    %26 = vector.broadcast %cst_31 : f32 to vector<271x128xf32>
    %27 = arith.cmpf oge, %25, %26 : vector<271x128xf32>
    %cst_32 = arith.constant 2.000000e-01 : f32
    %28 = vector.broadcast %cst_32 : f32 to vector<271x128xf32>
    %29 = arith.mulf %28, %25 : vector<271x128xf32>
    %30 = arith.select %27, %25, %29 : vector<271x128xi1>, vector<271x128xf32>
    %31 = arith.truncf %30 : vector<271x128xf32> to vector<271x128xbf16>
    %c0_33 = arith.constant 0 : index
    %c0_34 = arith.constant 0 : index
    %c0_35 = arith.constant 0 : index
    %32 = vector.load %arg6[%c0_33, %c0_34, %c0_35] : memref<1x271x128xbf16, #tpu.memory_space<vmem>>, vector<1x271x128xbf16>
    %33 = vector.shape_cast %32 : vector<1x271x128xbf16> to vector<271x128xbf16>
    %34 = vector.shape_cast %31 : vector<271x128xbf16> to vector<1x271x128xbf16>
    tpu.vector_store %arg6[%c0_33, %c0_34, %c0_35], %34 {strides = array<i32>} : memref<1x271x128xbf16, #tpu.memory_space<vmem>>, vector<1x271x128xbf16>,
    return
  }
  func.func @transform_0(%arg0: i32, %arg1: i32, %arg2: i32) -> (i32, i32, i32, i32) {
    %c0_i32 = arith.constant 0 : i32
    %c0_i32_0 = arith.constant 0 : i32
    %c0_i32_1 = arith.constant 0 : i32
    return %arg2, %arg0, %c0_i32, %c0_i32_0 : i32, i32, i32, i32
  }
  func.func @transform_1(%arg0: i32, %arg1: i32, %arg2: i32) -> (i32, i32, i32, i32) {
    %c0_i32 = arith.constant 0 : i32
    %c0_i32_0 = arith.constant 0 : i32
    %c0_i32_1 = arith.constant 0 : i32
    return %arg2, %c0_i32, %c0_i32_0, %arg1 : i32, i32, i32, i32
  }
  func.func @transform_2(%arg0: i32, %arg1: i32, %arg2: i32) -> (i32, i32) {
    %c0_i32 = arith.constant 0 : i32
    %c0_i32_0 = arith.constant 0 : i32
    return %c0_i32, %arg1 : i32, i32
  }
  func.func @transform_3(%arg0: i32, %arg1: i32, %arg2: i32) -> (i32, i32, i32) {
    %c0_i32 = arith.constant 0 : i32
    %c0_i32_0 = arith.constant 0 : i32
    return %arg0, %c0_i32, %arg1 : i32, i32, i32
  }
}

</mosaic_0001>

<bundles_post_ra>
// kernel: tpu_custom_call.1
= control target key start
LH: loop header
LB: loop body
LE: loop exit
PB: predicated region body
PF: predicated region fallthrough
CT: control target
= control target key end

     0   :  { %s3121_s12 = smov 0   ;;  %s3123_s13 = smov 0   ;;  %s3643_s0 = inlined_call_operand.vmem [shape: bf16[1,2,289,16], index: 0, kind: input, shape index: {}]   ;;  %s3644_s1 = inlined_call_operand.vmem [shape: bf16[1,4,16,128], index: 1, kind: input, shape index: {}]   ;;  %s3645_s2 = inlined_call_operand.vmem [shape: f32[1,128], index: 2, kind: input, shape index: {}]   ;;  %s3646_s3 = inlined_call_operand.vmem [shape: bf16[2,271,128], index: 3, kind: output, shape index: {}]  }
   0x1   :  { %s3125_s14 = smov 0  }
   0x2 LB: > { %s32_s15 = sadd.s32 1, %s3093_s13  ;;  %p2340_p0 = scmp.ge.s32.totalorder %s3097_s14, 1  ;;  %s3097_s14 = sphi %s3125_s14, %s13_s14   ;;  %s3093_s13 = sphi %s3123_s13, %s3648_s13   ;;  %s3089_s12 = sphi %s3121_s12, %s3647_s12  }
   0x3   : > { %p34_p1 = scmp.ge.s32.totalorder %s32_s15, 2  ;;  %p187_p2 = scmp.lt.s32.totalorder %s3097_s14, 3 }
   0x5   : > { %s3650_s15 = smov (%p34_p1, %s32_s15), 0  ;;  %p188_p3 = pnand %p2340_p0, %p187_p2 }
   0x6   : > { %v3019_v0 = vld [vmem:[%s3644_s1 + $0x8] sm:$0xff] (!%p188_p3)   ;;  %v3099_v1 = vmov (!%p188_p3), 0.0   ;;  %v3020_v2 = vld [vmem:[%s3644_s1] sm:$0xff] (!%p188_p3)   ;;  %vm3100_vm0 = vmmov (!%p188_p3), 0   ;;  %p231_p4 = scmp.lt.s32.totalorder (!%p188_p3), %s3089_s12, 1  ;;  %vm524_vm1 = vcmask (!%p188_p3), 130048  }
   0x7   : > { %191 = sbr.rel (%p188_p3) target bundleno = 517 (0x205), region = 32  ;;  %2711 = vmatprep.subr.bf16.mxu0 (!%p188_p3), %v3099_v1  ;;  %2781 = vmatprep.subr.bf16.mxu1 (!%p188_p3), %v3099_v1  ;;  %v3024_v3 = vld [vmem:[%s3644_s1 + $0x18] sm:$0xff] (!%p188_p3)   ;;  %vm382_vm2 = vsmask.f32 (!%p188_p3), 7424  ;;  %v3023_v12 = vld [vmem:[%s3644_s1 + $0x10] sm:$0xff] (!%p188_p3)   ;;  %vm1597_vm3 = vcmask (!%p188_p3), 1046528  }
   0x8   : > { %2712 = vmatpush3.bf16.msra.mxu0 (!%p188_p3), %v3019_v0  ;;  %2783 = vmatprep.mubr.msk.bf16.mxu1 (!%p188_p3), %vm3100_vm0, %v3099_v1 }
   0x9   : > { %2782 = vmatpush3.bf16.msra.mxu1 (!%p188_p3), %v3020_v2  ;;  %2713 = vmatprep.mubr.msk.bf16.mxu0 (!%p188_p3), %vm3100_vm0, %v3099_v1 }
   0xa   : > { %2851 = vmatprep.subr.bf16.mxu0 (!%p188_p3), %v3099_v1  ;;  %2921 = vmatprep.subr.bf16.mxu1 (!%p188_p3), %v3099_v1 }
   0xe   : > { %s3652_s12 = smov (!%p231_p4, %s3089_s12), 1 }
   0xf   : > { %s2991_s20 = smul.u32 148, %s3652_s12 }
  0x10   : > { %s2992_s30 = smul.u32 136, %s3652_s12 }
  0x11   : > { %s3159_s23 = scalar_lea.vmem %s3643_s0, %s2991_s20 }
  0x12   : > { %v3021_v4 = vld [vmem:[%s3159_s23] sm:$0xff]   ;;  %v3022_v5 = vld [vmem:[%s3159_s23 + $0x8] sm:$0xff]   ;;  %v3025_v9 = vld [vmem:[%s3159_s23 + $0x10] sm:$0xff]   ;;  %s3550_s6 = scalar_lea.vmem %s3646_s3, %s2992_s30 }
  0x13   : > { %2784 = vmatmul.mubr.msk.bf16.vlgmr.msra.gmra.mrb[0].mxu1 %vm524_vm1, %v3021_v4  ;;  %v384_v6 = vshrl.u32 %v3021_v4, 16  ;;  %v386_v7 = vshll.u32 %v3021_v4, 16  ;;  %v391_v8 = vshll.u32 %v3022_v5, 16  ;;  %v395_v14 = vshrl.u32 %v3022_v5, 16  ;;  %v3026_v19 = vld [vmem:[%s3159_s23 + $0x18] sm:$0xff]   ;;  %v3027_v25 = vld [vmem:[%s3159_s23 + $0x20] sm:$0xff]  }
  0x14   : > { %2922 = vmatpush3.bf16.msra.mxu1 %v3024_v3  ;;  %2787 = vmatprep.mubr.msk.bf16.mxu1 %vm3100_vm0, %v3099_v1  ;;  %v399_v15 = vshll.u32 %v3025_v9, 16  ;;  %v403_v21 = vshrl.u32 %v3025_v9, 16  ;;  %v407_v22 = vshll.u32 %v3026_v19, 16  ;;  %v411_v27 = vshrl.u32 %v3026_v19, 16  ;;  %v3028_v31 = vld [vmem:[%s3159_s23 + $0x28] sm:$0xff]   ;;  %v3029_v37 = vld [vmem:[%s3159_s23 + $0x30] sm:$0xff]  }
  0x15   : > { %v388_v10 = vrot.slane %v386_v7, 1  ;;  %v393_v11 = vrot.slane %v391_v8, 1  ;;  %v415_v28 = vshll.u32 %v3027_v25, 16  ;;  %v419_v33 = vshrl.u32 %v3027_v25, 16  ;;  %v3030_v43 = vld [vmem:[%s3159_s23 + $0x38] sm:$0xff]   ;;  %v3031_v49 = vld [vmem:[%s3159_s23 + $0x40] sm:$0xff]  }
  0x16   : > { %v401_v18 = vrot.slane %v399_v15, 1  ;;  %v409_v24 = vrot.slane %v407_v22, 1  ;;  %v423_v34 = vshll.u32 %v3028_v31, 16  ;;  %v427_v39 = vshrl.u32 %v3028_v31, 16  ;;  %v3032_v55 = vld [vmem:[%s3159_s23 + $0x48] sm:$0xff]   ;;  %v3033_v61 = vld [vmem:[%s3159_s23 + $0x50] sm:$0xff]  }
  0x17   : > { %v389_v13 = vor.u32 %v388_v10, %v384_v6  ;;  %v397_v17 = vor.u32 %v395_v14, %v393_v11  ;;  %v417_v30 = vrot.slane %v415_v28, 1  ;;  %v431_v40 = vshll.u32 %v3029_v37, 16  ;;  %v3034_v4 = vld [vmem:[%s3159_s23 + $0x58] sm:$0xff]   ;;  %v3035_v10 = vld [vmem:[%s3159_s23 + $0x60] sm:$0xff]   ;;  %v3037_v22 = vld [vmem:[%s3159_s23 + $0x70] sm:$0xff]  }
  0x18   : > { %v405_v23 = vor.u32 %v403_v21, %v401_v18  ;;  %v413_v29 = vor.u32 %v411_v27, %v409_v24  ;;  %v425_v36 = vrot.slane %v423_v34, 1  ;;  %v435_v45 = vshrl.u32 %v3029_v37, 16  ;;  %v3038_v28 = vld [vmem:[%s3159_s23 + $0x78] sm:$0xff]   ;;  %v3039_v34 = vld [vmem:[%s3159_s23 + $0x80] sm:$0xff]  }
  0x19   : > { %v394_v16 = vsel %vm382_vm2, %v389_v13, %v393_v11  ;;  %v402_v20 = vsel %vm382_vm2, %v397_v17, %v401_v18  ;;  %v421_v35 = vor.u32 %v419_v33, %v417_v30  ;;  %v433_v42 = vrot.slane %v431_v40, 1 }
  0x1a   : > { %2714 = vmatmul.mubr.msk.bf16.vlgmr.msra.gmra.mrb[0].mxu0 %vm524_vm1, %v394_v16  ;;  %v410_v26 = vsel %vm382_vm2, %v405_v23, %v409_v24  ;;  %v418_v32 = vsel %vm382_vm2, %v413_v29, %v417_v30  ;;  %v429_v41 = vor.u32 %v427_v39, %v425_v36  ;;  %v439_v46 = vshll.u32 %v3030_v43, 16  ;;  %v3036_v16 = vld [vmem:[%s3159_s23 + $0x68] sm:$0xff]  }
  0x1b   : > { %2852 = vmatpush3.bf16.msra.mxu0 %v3023_v12  ;;  %2717 = vmatprep.mubr.msk.bf16.mxu0 %vm3100_vm0, %v3099_v1  ;;  %v426_v38 = vsel %vm382_vm2, %v421_v35, %v425_v36  ;;  %v437_v47 = vor.u32 %v435_v45, %v433_v42  ;;  %v443_v51 = vshrl.u32 %v3030_v43, 16  ;;  %v447_v52 = vshll.u32 %v3031_v49, 16  ;;  %v3043_v45 = vld [vmem:[%s3159_s23 + $0x10] sm:$0xff]  }
  0x1c   : > { %2788 = vmatmul.mubr.msk.bf16.gmra.mrb[4].mxu1 %vm524_vm1, %v3022_v5  ;;  %v434_v44 = vsel %vm382_vm2, %v429_v41, %v433_v42  ;;  %v441_v48 = vrot.slane %v439_v46, 1  ;;  %v451_v57 = vshrl.u32 %v3031_v49, 16  ;;  %v455_v58 = vshll.u32 %v3032_v55, 16  ;;  %v3042_v41 = vld [vmem:[%s3159_s23 + $0x8] sm:$0xff]  }
  0x1d   : > { %2791 = vmatprep.mubr.msk.bf16.mxu1 %vm3100_vm0, %v3099_v1  ;;  %v449_v54 = vrot.slane %v447_v52, 1  ;;  %v459_v63 = vshrl.u32 %v3032_v55, 16  ;;  %v463_v0 = vshll.u32 %v3033_v61, 16  ;;  %v467_v6 = vshrl.u32 %v3033_v61, 16  ;;  %v3040_v42 = vld [vmem:[%s3159_s23 + $0x8] sm:$0xfe]  }
  0x1e   : > { %v442_v50 = vsel %vm382_vm2, %v437_v47, %v441_v48  ;;  %v445_v53 = vor.u32 %v443_v51, %v441_v48  ;;  %v457_v60 = vrot.slane %v455_v58, 1  ;;  %v471_v7 = vshll.u32 %v3034_v4, 16 }
  0x1f   : > { %v453_v59 = vor.u32 %v451_v57, %v449_v54  ;;  %v465_v3 = vrot.slane %v463_v0, 1  ;;  %v475_v12 = vshrl.u32 %v3034_v4, 16  ;;  %v479_v13 = vshll.u32 %v3035_v10, 16  ;;  %v3045_v57 = vld [vmem:[%s3159_s23 + $0x18] sm:$0xff]  }
  0x20   : > { %v450_v56 = vsel %vm382_vm2, %v445_v53, %v449_v54  ;;  %v461_v2 = vor.u32 %v459_v63, %v457_v60  ;;  %v483_v18 = vshrl.u32 %v3035_v10, 16  ;;  %v491_v24 = vshrl.u32 %v3036_v16, 16  ;;  %v3044_v54 = vld [vmem:[%s3159_s23 + $0x18] sm:$0xff]   ;;  %v3046_v63 = vld [vmem:[%s3159_s23 + $0x20] sm:$0xff]  }
  0x21   : > { %v458_v62 = vsel %vm382_vm2, %v453_v59, %v457_v60  ;;  %v469_v8 = vor.u32 %v467_v6, %v465_v3  ;;  %v481_v15 = vrot.slane %v479_v13, 1  ;;  %v499_v30 = vshrl.u32 %v3037_v22, 16 }
  0x22   : > { %2718 = vmatmul.mubr.msk.bf16.gmra.mrb[4].mxu0 %vm524_vm1, %v402_v20  ;;  %v466_v5 = vsel %vm382_vm2, %v461_v2, %v465_v3  ;;  %v507_v36 = vshrl.u32 %v3038_v28, 16  ;;  %v1079_v46 = vshll.u32 %v3042_v41, 16  ;;  %v1598_v47 = vrot.slane %v3040_v42, 1  ;;  %v3047_v3 = vld [vmem:[%s3159_s23 + $0x20] sm:$0xff]  }
  0x23   : > { %2721 = vmatprep.mubr.msk.bf16.mxu0 %vm3100_vm0, %v3099_v1  ;;  %v485_v20 = vor.u32 %v483_v18, %v481_v15  ;;  %v1084_v52 = vshll.u32 %v3043_v45, 16  ;;  %v1601_v58 = vrot.slane %v3044_v54, 1  ;;  %v1088_v60 = vshrl.u32 %v3043_v45, 16  ;;  %v3050_v18 = vld [vmem:[%s3159_s23 + $0x30] sm:$0xff]   ;;  %v3056_v45 = vld [vmem:[%s3159_s23 + $0x48] sm:$0xff]  }
  0x24   : > { %2792 = vmatmul.mubr.msk.bf16.gmra.mrb[8].mxu1 %vm524_vm1, %v3025_v9  ;;  %v473_v9 = vrot.slane %v471_v7, 1  ;;  %v1081_v51 = vrot.slane %v1079_v46, 1  ;;  %v1096_v6 = vshrl.u32 %v3045_v57, 16  ;;  %v1100_v7 = vshll.u32 %v3047_v3, 16  ;;  %v3058_v54 = vld [vmem:[%s3159_s23 + $0x50] sm:$0xff]  }
  0x25   : > { %2795 = vmatprep.mubr.msk.bf16.mxu1 %vm3100_vm0, %v3099_v1 }
  0x26   : > { %v474_v11 = vsel %vm382_vm2, %v469_v8, %v473_v9  ;;  %v477_v14 = vor.u32 %v475_v12, %v473_v9  ;;  %v3048_v9 = vld [vmem:[%s3159_s23 + $0x28] sm:$0xff]  }
  0x27   : > { %v3049_v12 = vld [vmem:[%s3159_s23 + $0x28] sm:$0xff]   ;;  %v1605_v13 = vrot.slane %v3048_v9, 1  ;;  %v3062_v9 = vld [vmem:[%s3159_s23 + $0x60] sm:$0xff]  }
  0x28   : > { %v482_v17 = vsel %vm382_vm2, %v477_v14, %v481_v15  ;;  %v1104_v15 = vshrl.u32 %v3047_v3, 16  ;;  %v3061_v3 = vld [vmem:[%s3159_s23 + $0x58] sm:$0xff]  }
  0x2a   : > { %2722 = vmatmul.mubr.msk.bf16.gmra.mrb[8].mxu0 %vm524_vm1, %v410_v26 }
  0x2b   : > { %2725 = vmatprep.mubr.msk.bf16.mxu0 %vm3100_vm0, %v3099_v1 }
  0x2c   : > { %2796 = vmatmul.mubr.msk.bf16.gmra.mrb[12].mxu1 %vm524_vm1, %v3026_v19  ;;  %v487_v19 = vshll.u32 %v3036_v16, 16 }
  0x2d   : > { %2799 = vmatprep.mubr.msk.bf16.mxu1 %vm3100_vm0, %v3099_v1 }
  0x2e   : > { %v489_v21 = vrot.slane %v487_v19, 1 }
  0x30   : > { %v490_v23 = vsel %vm382_vm2, %v485_v20, %v489_v21  ;;  %v493_v26 = vor.u32 %v491_v24, %v489_v21  ;;  %v3051_v21 = vld [vmem:[%s3159_s23 + $0x30] sm:$0xff]   ;;  %v1112_v24 = vshrl.u32 %v3049_v12, 16 }
  0x32   : > { %2726 = vmatmul.mubr.msk.bf16.gmra.mrb[12].mxu0 %vm524_vm1, %v418_v32 }
  0x33   : > { %2729 = vmatprep.mubr.msk.bf16.mxu0 %vm3100_vm0, %v3099_v1 }
  0x34   : > { %2800 = vmatmul.mubr.msk.bf16.gmra.mrb[16].mxu1 %vm524_vm1, %v3027_v25  ;;  %v495_v25 = vshll.u32 %v3037_v22, 16 }
  0x35   : > { %2803 = vmatprep.mubr.msk.bf16.mxu1 %vm3100_vm0, %v3099_v1 }
  0x36   : > { %v497_v27 = vrot.slane %v495_v25, 1  ;;  %v1116_v25 = vshll.u32 %v3051_v21, 16 }
  0x38   : > { %v498_v29 = vsel %vm382_vm2, %v493_v26, %v497_v27  ;;  %v501_v32 = vor.u32 %v499_v30, %v497_v27  ;;  %v3052_v27 = vld [vmem:[%s3159_s23 + $0x38] sm:$0xff]  }
  0x39   : > { %v3053_v30 = vld [vmem:[%s3159_s23 + $0x38] sm:$0xff]  }
  0x3a   : > { %2730 = vmatmul.mubr.msk.bf16.gmra.mrb[16].mxu0 %vm524_vm1, %v426_v38  ;;  %v1128_v42 = vshrl.u32 %v3053_v30, 16 }
  0x3b   : > { %2733 = vmatprep.mubr.msk.bf16.mxu0 %vm3100_vm0, %v3099_v1 }
  0x3c   : > { %2804 = vmatmul.mubr.msk.bf16.gmra.mrb[20].mxu1 %vm524_vm1, %v3028_v31  ;;  %v503_v31 = vshll.u32 %v3038_v28, 16 }
  0x3d   : > { %2807 = vmatprep.mubr.msk.bf16.mxu1 %vm3100_vm0, %v3099_v1 }
  0x3e   : > { %v505_v33 = vrot.slane %v503_v31, 1  ;;  %v1609_v31 = vrot.slane %v3052_v27, 1 }
  0x40   : > { %v506_v35 = vsel %vm382_vm2, %v501_v32, %v505_v33  ;;  %v509_v38 = vor.u32 %v507_v36, %v505_v33  ;;  %v1120_v33 = vshrl.u32 %v3051_v21, 16  ;;  %v3054_v36 = vld [vmem:[%s3159_s23 + $0x40] sm:$0xff]  }
  0x42   : > { %2734 = vmatmul.mubr.msk.bf16.gmra.mrb[20].mxu0 %vm524_vm1, %v434_v44  ;;  %v515_v44 = vshrl.u32 %v3039_v34, 16 }
  0x43   : > { %2737 = vmatprep.mubr.msk.bf16.mxu0 %vm3100_vm0, %v3099_v1 }
  0x44   : > { %2808 = vmatmul.mubr.msk.bf16.gmra.mrb[24].mxu1 %vm524_vm1, %v3029_v37  ;;  %v511_v37 = vshll.u32 %v3039_v34, 16 }
  0x45   : > { %2811 = vmatprep.mubr.msk.bf16.mxu1 %vm3100_vm0, %v3099_v1 }
  0x46   : > { %v513_v39 = vrot.slane %v511_v37, 1 }
  0x48   : > { %v514_v40 = vsel %vm382_vm2, %v509_v38, %v513_v39 }
  0x4a   : > { %2738 = vmatmul.mubr.msk.bf16.gmra.mrb[24].mxu0 %vm524_vm1, %v442_v50  ;;  %v1077_v50 = vshrl.u32 %v3042_v41, 16 }
  0x4b   : > { %2741 = vmatprep.mubr.msk.bf16.mxu0 %vm3100_vm0, %v3099_v1 }
  0x4c   : > { %2812 = vmatmul.mubr.msk.bf16.gmra.mrb[28].mxu1 %vm524_vm1, %v3030_v43  ;;  %v3041_v43 = vld [vmem:[%s3159_s23 + $0x10] sm:$0xff]  }
  0x4d   : > { %2815 = vmatprep.mubr.msk.bf16.mxu1 %vm3100_vm0, %v3099_v1  ;;  %v1599_v48 = vrot.slane %v3041_v43, 1 }
  0x4f   : > { %v1600_v53 = vsel %vm1597_vm3, %v1598_v47, %v1599_v48 }
  0x52   : > { %2742 = vmatmul.mubr.msk.bf16.gmra.mrb[28].mxu0 %vm524_vm1, %v450_v56  ;;  %v1086_v56 = vrot.slane %v1084_v52, 1 }
  0x53   : > { %2745 = vmatprep.mubr.msk.bf16.mxu0 %vm3100_vm0, %v3099_v1 }
  0x54   : > { %2816 = vmatmul.mubr.msk.bf16.gmra.mrb[32].mxu1 %vm524_vm1, %v3031_v49  ;;  %v517_v49 = vor.u32 %v515_v44, %v513_v39  ;;  %v1090_v0 = vor.u32 %v1088_v60, %v1086_v56  ;;  %v3055_v39 = vld [vmem:[%s3159_s23 + $0x40] sm:$0xff]  }
  0x55   : > { %2819 = vmatprep.mubr.msk.bf16.mxu1 %vm3100_vm0, %v3099_v1  ;;  %v1132_v43 = vshll.u32 %v3055_v39, 16 }
  0x57   : > { %v1134_v47 = vrot.slane %v1132_v43, 1 }
  0x5a   : > { %2746 = vmatmul.mubr.msk.bf16.gmra.mrb[32].mxu0 %vm524_vm1, %v458_v62  ;;  %v1602_v62 = vsel %vm1597_vm3, %v1599_v48, %v1601_v58  ;;  %v3057_v48 = vld [vmem:[%s3159_s23 + $0x48] sm:$0xff]  }
  0x5b   : > { %2749 = vmatprep.mubr.msk.bf16.mxu0 %vm3100_vm0, %v3099_v1  ;;  %v1140_v52 = vshll.u32 %v3057_v48, 16  ;;  %v1144_v60 = vshrl.u32 %v3057_v48, 16 }
  0x5c   : > { %2820 = vmatmul.mubr.msk.bf16.gmra.mrb[36].mxu1 %vm524_vm1, %v3032_v55  ;;  %v1082_v55 = vor.u32 %v1081_v51, %v1077_v50  ;;  %v1136_v51 = vshrl.u32 %v3055_v39, 16 }
  0x5d   : > { %2823 = vmatprep.mubr.msk.bf16.mxu1 %vm3100_vm0, %v3099_v1 }
  0x5e   : > { %v1087_v59 = vsel %vm382_vm2, %v1082_v55, %v1086_v56  ;;  %v1138_v55 = vor.u32 %v1136_v51, %v1134_v47  ;;  %v1142_v56 = vrot.slane %v1140_v52, 1 }
  0x62   : > { %2750 = vmatmul.mubr.msk.bf16.gmra.mrb[36].mxu0 %vm524_vm1, %v466_v5 }
  0x63   : > { %2753 = vmatprep.mubr.msk.bf16.mxu0 %vm3100_vm0, %v3099_v1 }
  0x64   : > { %2824 = vmatmul.mubr.msk.bf16.gmra.mrb[40].mxu1 %vm524_vm1, %v3033_v61  ;;  %v1092_v61 = vshll.u32 %v3045_v57, 16  ;;  %v3059_v57 = vld [vmem:[%s3159_s23 + $0x50] sm:$0xff]  }
  0x65   : > { %2827 = vmatprep.mubr.msk.bf16.mxu1 %vm3100_vm0, %v3099_v1 }
  0x66   : > { %v1094_v2 = vrot.slane %v1092_v61, 1  ;;  %v1148_v61 = vshll.u32 %v3059_v57, 16 }
  0x68   : > { %v1095_v5 = vsel %vm382_vm2, %v1090_v0, %v1094_v2  ;;  %v1146_v0 = vor.u32 %v1144_v60, %v1142_v56 }
  0x6a   : > { %2754 = vmatmul.mubr.msk.bf16.gmra.mrb[40].mxu0 %vm524_vm1, %v474_v11  ;;  %v1102_v11 = vrot.slane %v1100_v7, 1  ;;  %v1156_v7 = vshll.u32 %v3061_v3, 16 }
  0x6b   : > { %2757 = vmatprep.mubr.msk.bf16.mxu0 %vm3100_vm0, %v3099_v1 }
  0x6c   : > { %2828 = vmatmul.mubr.msk.bf16.gmra.mrb[44].mxu1 %vm524_vm1, %v3034_v4  ;;  %v1603_v4 = vrot.slane %v3046_v63, 1  ;;  %v1106_v19 = vor.u32 %v1104_v15, %v1102_v11  ;;  %v3060_v63 = vld [vmem:[%s3159_s23 + $0x58] sm:$0xff]  }
  0x6d   : > { %2831 = vmatprep.mubr.msk.bf16.mxu1 %vm3100_vm0, %v3099_v1 }
  0x6e   : > { %v1604_v8 = vsel %vm1597_vm3, %v1601_v58, %v1603_v4  ;;  %v1615_v58 = vrot.slane %v3058_v54, 1 }
  0x72   : > { %2758 = vmatmul.mubr.msk.bf16.gmra.mrb[44].mxu0 %vm524_vm1, %v482_v17  ;;  %v1606_v17 = vsel %vm1597_vm3, %v1603_v4, %v1605_v13  ;;  %v1617_v4 = vrot.slane %v3060_v63, 1  ;;  %v3069_v63 = vld [vmem:[%s3159_s23 + $0x78] sm:$0xff]  }
  0x73   : > { %2761 = vmatprep.mubr.msk.bf16.mxu0 %vm3100_vm0, %v3099_v1 }
  0x74   : > { %2832 = vmatmul.mubr.msk.bf16.gmra.mrb[48].mxu1 %vm524_vm1, %v3035_v10  ;;  %v1098_v10 = vor.u32 %v1096_v6, %v1094_v2  ;;  %v1150_v2 = vrot.slane %v1148_v61, 1  ;;  %v1152_v6 = vshrl.u32 %v3059_v57, 16 }
  0x75   : > { %2835 = vmatprep.mubr.msk.bf16.mxu1 %vm3100_vm0, %v3099_v1 }
  0x76   : > { %v1103_v14 = vsel %vm382_vm2, %v1098_v10, %v1102_v11  ;;  %v1154_v10 = vor.u32 %v1152_v6, %v1150_v2  ;;  %v1158_v11 = vrot.slane %v1156_v7, 1 }
  0x78   : > { %v1159_v15 = vsel %vm382_vm2, %v1154_v10, %v1158_v11 }
  0x7a   : > { %2762 = vmatmul.mubr.msk.bf16.gmra.mrb[48].mxu0 %vm524_vm1, %v490_v23 }
  0x7b   : > { %2765 = vmatprep.mubr.msk.bf16.mxu0 %vm3100_vm0, %v3099_v1 }
  0x7c   : > { %2836 = vmatmul.mubr.msk.bf16.gmra.mrb[52].mxu1 %vm524_vm1, %v3036_v16  ;;  %v1108_v16 = vshll.u32 %v3049_v12, 16  ;;  %v3063_v12 = vld [vmem:[%s3159_s23 + $0x60] sm:$0xff]  }
  0x7d   : > { %2839 = vmatprep.mubr.msk.bf16.mxu1 %vm3100_vm0, %v3099_v1 }
  0x7e   : > { %v1110_v20 = vrot.slane %v1108_v16, 1 }
  0x80   : > { %v1111_v23 = vsel %vm382_vm2, %v1106_v19, %v1110_v20 }
  0x82   : > { %2766 = vmatmul.mubr.msk.bf16.gmra.mrb[52].mxu0 %vm524_vm1, %v498_v29  ;;  %v1118_v29 = vrot.slane %v1116_v25, 1  ;;  %v3065_v25 = vld [vmem:[%s3159_s23 + $0x68] sm:$0xff]  }
  0x83   : > { %2769 = vmatprep.mubr.msk.bf16.mxu0 %vm3100_vm0, %v3099_v1  ;;  %v1176_v52 = vshrl.u32 %v3065_v25, 16 }
  0x84   : > { %2840 = vmatmul.mubr.msk.bf16.gmra.mrb[56].mxu1 %vm524_vm1, %v3037_v22  ;;  %v1607_v22 = vrot.slane %v3050_v18, 1  ;;  %v1122_v37 = vor.u32 %v1120_v33, %v1118_v29  ;;  %v1164_v18 = vshll.u32 %v3063_v12, 16  ;;  %v1168_v33 = vshrl.u32 %v3063_v12, 16 }
  0x85   : > { %2843 = vmatprep.mubr.msk.bf16.mxu1 %vm3100_vm0, %v3099_v1 }
  0x86   : > { %v1608_v26 = vsel %vm1597_vm3, %v1605_v13, %v1607_v22  ;;  %v1619_v13 = vrot.slane %v3062_v9, 1  ;;  %v1188_v9 = vshll.u32 %v3069_v63, 16 }
  0x88   : > { %v1620_v21 = vsel %vm1597_vm3, %v1617_v4, %v1619_v13 }
  0x8a   : > { %2770 = vmatmul.mubr.msk.bf16.gmra.mrb[56].mxu0 %vm524_vm1, %v506_v35  ;;  %v1610_v35 = vsel %vm1597_vm3, %v1607_v22, %v1609_v31  ;;  %v3064_v22 = vld [vmem:[%s3159_s23 + $0x68] sm:$0xff]  }
  0x8b   : > { %2773 = vmatprep.mubr.msk.bf16.mxu0 %vm3100_vm0, %v3099_v1  ;;  %v1621_v27 = vrot.slane %v3064_v22, 1 }
  0x8c   : > { %2844 = vmatmul.mubr.msk.bf16.gmra.mrb[60].mxu1 %vm524_vm1, %v3038_v28  ;;  %v1114_v28 = vor.u32 %v1112_v24, %v1110_v20  ;;  %v1166_v24 = vrot.slane %v1164_v18, 1  ;;  %v1190_v18 = vrot.slane %v1188_v9, 1 }
  0x8d   : > { %2847 = vmatprep.mubr.msk.bf16.mxu1 %vm3100_vm0, %v3099_v1  ;;  %v1622_v39 = vsel %vm1597_vm3, %v1619_v13, %v1621_v27 }
  0x8e   : > { %v1119_v32 = vsel %vm382_vm2, %v1114_v28, %v1118_v29 }
  0x92   : > { %2774 = vmatmul.mubr.msk.bf16.gmra.mrb[60].mxu0 %vm524_vm1, %v514_v40  ;;  %v1611_v40 = vrot.slane %v3054_v36, 1 }
  0x93   : > { %2777 = vmatprep.mubr.msk.bf16.mxu0 %vm3100_vm0, %v3099_v1 }
  0x94   : > { %2848 = vmatmul.mubr.msk.bf16.gmra.mrb[64].mxu1 %vm524_vm1, %v3039_v34  ;;  %v1124_v34 = vshll.u32 %v3053_v30, 16  ;;  %v1612_v44 = vsel %vm1597_vm3, %v1609_v31, %v1611_v40 }
  0x95   : > { %2923 = vmatprep.mubr.msk.bf16.mxu1 %vm3100_vm0, %v3099_v1 }
  0x96   : > { %v1126_v38 = vrot.slane %v1124_v34, 1  ;;  %v1172_v34 = vshll.u32 %v3065_v25, 16 }
  0x98   : > { %v1127_v41 = vsel %vm382_vm2, %v1122_v37, %v1126_v38  ;;  %v1130_v46 = vor.u32 %v1128_v42, %v1126_v38  ;;  %v1170_v42 = vor.u32 %v1168_v33, %v1166_v24  ;;  %v1174_v43 = vrot.slane %v1172_v34, 1 }
  0x9a   : > { %2778 = vmatmul.mubr.msk.bf16.gmra.mrb[64].mxu0 %vm524_vm1, %v517_v49  ;;  %v1613_v49 = vrot.slane %v3056_v45, 1  ;;  %v1135_v50 = vsel %vm382_vm2, %v1130_v46, %v1134_v47  ;;  %v1178_v61 = vor.u32 %v1176_v52, %v1174_v43 }
  0x9b   : > { %2853 = vmatprep.mubr.msk.bf16.mxu0 %vm3100_vm0, %v3099_v1 }
  0x9c   : > { %2924 = vmatmul.mubr.msk.bf16.vlgmr.msra.gmra.mrb[68].mxu1 %vm524_vm1, %v1600_v53  ;;  %v1614_v53 = vsel %vm1597_vm3, %v1611_v40, %v1613_v49  ;;  %v3066_v40 = vld [vmem:[%s3159_s23 + $0x70] sm:$0xff]  }
  0x9d   : > { %2927 = vmatprep.mubr.msk.bf16.mxu1 %vm3100_vm0, %v3099_v1  ;;  %v1623_v46 = vrot.slane %v3066_v40, 1  ;;  %v3073_v40 = vld [vmem:[%s3159_s23 + $0x88] sm:$0xff]  }
  0xa2   : > { %2854 = vmatmul.mubr.msk.bf16.vlgmr.msra.gmra.mrb[68].mxu0 %vm524_vm1, %v1087_v59  ;;  %v1143_v59 = vsel %vm382_vm2, %v1138_v55, %v1142_v56 }
  0xa3   : > { %2857 = vmatprep.mubr.msk.bf16.mxu0 %vm3100_vm0, %v3099_v1 }
  0xa4   : > { %2928 = vmatmul.mubr.msk.bf16.gmra.mrb[72].mxu1 %vm524_vm1, %v1602_v62  ;;  %v1616_v62 = vsel %vm1597_vm3, %v1613_v49, %v1615_v58 }
  0xa5   : > { %2931 = vmatprep.mubr.msk.bf16.mxu1 %vm3100_vm0, %v3099_v1 }
  0xaa   : > { %2858 = vmatmul.mubr.msk.bf16.gmra.mrb[72].mxu0 %vm524_vm1, %v1095_v5  ;;  %v1151_v5 = vsel %vm382_vm2, %v1146_v0, %v1150_v2 }
  0xab   : > { %2861 = vmatprep.mubr.msk.bf16.mxu0 %vm3100_vm0, %v3099_v1 }
  0xac   : > { %2932 = vmatmul.mubr.msk.bf16.gmra.mrb[76].mxu1 %vm524_vm1, %v1604_v8  ;;  %v1618_v8 = vsel %vm1597_vm3, %v1615_v58, %v1617_v4  ;;  %v1624_v58 = vsel %vm1597_vm3, %v1621_v27, %v1623_v46  ;;  %v1192_v27 = vshrl.u32 %v3069_v63, 16 }
  0xad   : > { %2935 = vmatprep.mubr.msk.bf16.mxu1 %vm3100_vm0, %v3099_v1 }
  0xb2   : > { %2862 = vmatmul.mubr.msk.bf16.gmra.mrb[76].mxu0 %vm524_vm1, %v1103_v14 }
  0xb3   : > { %2865 = vmatprep.mubr.msk.bf16.mxu0 %vm3100_vm0, %v3099_v1 }
  0xb4   : > { %2936 = vmatmul.mubr.msk.bf16.gmra.mrb[80].mxu1 %vm524_vm1, %v1606_v17  ;;  %v1160_v17 = vshrl.u32 %v3061_v3, 16 }
  0xb5   : > { %2939 = vmatprep.mubr.msk.bf16.mxu1 %vm3100_vm0, %v3099_v1 }
  0xba   : > { %2866 = vmatmul.mubr.msk.bf16.gmra.mrb[80].mxu0 %vm524_vm1, %v1111_v23  ;;  %v1162_v23 = vor.u32 %v1160_v17, %v1158_v11 }
  0xbb   : > { %2869 = vmatprep.mubr.msk.bf16.mxu0 %vm3100_vm0, %v3099_v1 }
  0xbc   : > { %2940 = vmatmul.mubr.msk.bf16.gmra.mrb[84].mxu1 %vm524_vm1, %v1608_v26  ;;  %v1167_v31 = vsel %vm382_vm2, %v1162_v23, %v1166_v24 }
  0xbd   : > { %2943 = vmatprep.mubr.msk.bf16.mxu1 %vm3100_vm0, %v3099_v1 }
  0xc2   : > { %2870 = vmatmul.mubr.msk.bf16.gmra.mrb[84].mxu0 %vm524_vm1, %v1119_v32 }
  0xc3   : > { %2873 = vmatprep.mubr.msk.bf16.mxu0 %vm3100_vm0, %v3099_v1 }
  0xc4   : > { %2944 = vmatmul.mubr.msk.bf16.gmra.mrb[88].mxu1 %vm524_vm1, %v1610_v35 }
  0xc5   : > { %2947 = vmatprep.mubr.msk.bf16.mxu1 %vm3100_vm0, %v3099_v1 }
  0xca   : > { %2874 = vmatmul.mubr.msk.bf16.gmra.mrb[88].mxu0 %vm524_vm1, %v1127_v41 }
  0xcb   : > { %2877 = vmatprep.mubr.msk.bf16.mxu0 %vm3100_vm0, %v3099_v1 }
  0xcc   : > { %2948 = vmatmul.mubr.msk.bf16.gmra.mrb[92].mxu1 %vm524_vm1, %v1612_v44  ;;  %v3067_v44 = vld [vmem:[%s3159_s23 + $0x70] sm:$0xff]  }
  0xcd   : > { %2951 = vmatprep.mubr.msk.bf16.mxu1 %vm3100_vm0, %v3099_v1 }
  0xd2   : > { %2878 = vmatmul.mubr.msk.bf16.gmra.mrb[92].mxu0 %vm524_vm1, %v1135_v50  ;;  %v1175_v50 = vsel %vm382_vm2, %v1170_v42, %v1174_v43 }
  0xd3   : > { %2881 = vmatprep.mubr.msk.bf16.mxu0 %vm3100_vm0, %v3099_v1 }
  0xd4   : > { %2952 = vmatmul.mubr.msk.bf16.gmra.mrb[96].mxu1 %vm524_vm1, %v1614_v53  ;;  %v1180_v53 = vshll.u32 %v3067_v44, 16 }
  0xd5   : > { %2955 = vmatprep.mubr.msk.bf16.mxu1 %vm3100_vm0, %v3099_v1 }
  0xda   : > { %2882 = vmatmul.mubr.msk.bf16.gmra.mrb[96].mxu0 %vm524_vm1, %v1143_v59  ;;  %v3068_v59 = vld [vmem:[%s3159_s23 + $0x78] sm:$0xff]  }
  0xdb   : > { %2885 = vmatprep.mubr.msk.bf16.mxu0 %vm3100_vm0, %v3099_v1  ;;  %v1625_v2 = vrot.slane %v3068_v59, 1 }
  0xdc   : > { %2956 = vmatmul.mubr.msk.bf16.gmra.mrb[100].mxu1 %vm524_vm1, %v1616_v62  ;;  %v1182_v62 = vrot.slane %v1180_v53, 1 }
  0xdd   : > { %2959 = vmatprep.mubr.msk.bf16.mxu1 %vm3100_vm0, %v3099_v1 }
  0xde   : > { %v1183_v6 = vsel %vm382_vm2, %v1178_v61, %v1182_v62 }
  0xe2   : > { %2886 = vmatmul.mubr.msk.bf16.gmra.mrb[100].mxu0 %vm524_vm1, %v1151_v5 }
  0xe3   : > { %2889 = vmatprep.mubr.msk.bf16.mxu0 %vm3100_vm0, %v3099_v1 }
  0xe4   : > { %2960 = vmatmul.mubr.msk.bf16.gmra.mrb[104].mxu1 %vm524_vm1, %v1618_v8  ;;  %v1184_v8 = vshrl.u32 %v3067_v44, 16 }
  0xe5   : > { %2963 = vmatprep.mubr.msk.bf16.mxu1 %vm3100_vm0, %v3099_v1 }
  0xe6   : > { %v819_v14 = vpop.f32.mrb[0].mxu1  ;;  %v1186_v17 = vor.u32 %v1184_v8, %v1182_v62 }
  0xe7   : > { %v2785_v16 = vpop.f32.mrb[1].mxu1 }
  0xe8   : > { %v822_v19 = vpop.f32.mrb[2].mxu1  ;;  %v1191_v25 = vsel %vm382_vm2, %v1186_v17, %v1190_v18 }
  0xe9   : > { %v2786_v20 = vpop.f32.mrb[3].mxu1 }
  0xea   : > { %2890 = vmatmul.mubr.msk.bf16.gmra.mrb[104].mxu0 %vm524_vm1, %v1159_v15  ;;  %v3070_v15 = vld [vmem:[%s3159_s23 + $0x80] sm:$0xff]  }
  0xeb   : > { %2893 = vmatprep.mubr.msk.bf16.mxu0 %vm3100_vm0, %v3099_v1 }
  0xec   : > { %2964 = vmatmul.mubr.msk.bf16.gmra.mrb[108].mxu1 %vm524_vm1, %v1620_v21  ;;  %v1627_v21 = vrot.slane %v3070_v15, 1 }
  0xed   : > { %v610_v26 = vpop.f32.mrb[0].mxu0  ;;  %2967 = vmatprep.mubr.msk.bf16.mxu1 %vm3100_vm0, %v3099_v1 }
  0xee   : > { %v3412_v28 = vadd.f32 %v819_v14, %v610_v26  ;;  %v2715_v29 = vpop.f32.mrb[1].mxu0  ;;  %v1626_v14 = vsel %vm1597_vm3, %v1623_v46, %v1625_v2  ;;  %v1628_v34 = vsel %vm1597_vm3, %v1625_v2, %v1627_v21 }
  0xef   : > { %v613_v30 = vpop.f32.mrb[2].mxu0  ;;  %v827_v32 = vpop.f32.mrb[4].mxu1 }
  0xf0   : > { %v3415_v35 = vadd.f32 %v822_v19, %v613_v30  ;;  %v2716_v36 = vpop.f32.mrb[3].mxu0  ;;  %v2789_v37 = vpop.f32.mrb[5].mxu1  ;;  %v3071_v19 = vld [vmem:[%s3159_s23 + $0x80] sm:$0xff]  }
  0xf1   : > { %v830_v38 = vpop.f32.mrb[6].mxu1  ;;  %v1196_v29 = vshll.u32 %v3071_v19, 16  ;;  %v3072_v36 = vld [vmem:[%s3159_s23 + $0x88] sm:$0xff]  }
  0xf2   : > { %2894 = vmatmul.mubr.msk.bf16.gmra.mrb[108].mxu0 %vm524_vm1, %v1167_v31  ;;  %v2790_v41 = vpop.f32.mrb[7].mxu1  ;;  %v1629_v42 = vrot.slane %v3072_v36, 1 }
  0xf3   : > { %2897 = vmatprep.mubr.msk.bf16.mxu0 %vm3100_vm0, %v3099_v1 }
  0xf4   : > { %2968 = vmatmul.mubr.msk.bf16.gmra.mrb[112].mxu1 %vm524_vm1, %v1622_v39  ;;  %v1198_v39 = vrot.slane %v1196_v29, 1 }
  0xf5   : > { %v618_v45 = vpop.f32.mrb[4].mxu0  ;;  %2971 = vmatprep.mubr.msk.bf16.mxu1 %vm3100_vm0, %v3099_v1 }
  0xf6   : > { %v3426_v47 = vadd.f32 %v827_v32, %v618_v45  ;;  %v2719_v48 = vpop.f32.mrb[5].mxu0 }
  0xf7   : > { %v621_v49 = vpop.f32.mrb[6].mxu0  ;;  %v835_v51 = vpop.f32.mrb[8].mxu1 }
  0xf8   : > { %v3429_v54 = vadd.f32 %v830_v38, %v621_v49  ;;  %v2720_v55 = vpop.f32.mrb[7].mxu0  ;;  %v2793_v56 = vpop.f32.mrb[9].mxu1  ;;  %v1194_v38 = vor.u32 %v1192_v27, %v1190_v18  ;;  %v1200_v49 = vshrl.u32 %v3071_v19, 16 }
  0xf9   : > { %v838_v57 = vpop.f32.mrb[10].mxu1  ;;  %v1630_v56 = vsel %vm1597_vm3, %v1627_v21, %v1629_v42 }
  0xfa   : > { %2898 = vmatmul.mubr.msk.bf16.gmra.mrb[112].mxu0 %vm524_vm1, %v1175_v50  ;;  %v2794_v60 = vpop.f32.mrb[11].mxu1  ;;  %v1199_v46 = vsel %vm382_vm2, %v1194_v38, %v1198_v39  ;;  %v1204_v50 = vshll.u32 %v3073_v40, 16  ;;  %v1202_v59 = vor.u32 %v1200_v49, %v1198_v39 }
  0xfb   : > { %2901 = vmatprep.mubr.msk.bf16.mxu0 %vm3100_vm0, %v3099_v1 }
  0xfc   : > { %2972 = vmatmul.mubr.msk.bf16.gmra.mrb[116].mxu1 %vm524_vm1, %v1624_v58  ;;  %v1206_v60 = vrot.slane %v1204_v50, 1 }
  0xfd   : > { %v626_v0 = vpop.f32.mrb[8].mxu0  ;;  %2975 = vmatprep.mubr.msk.bf16.mxu1 %vm3100_vm0, %v3099_v1 }
  0xfe   : > { %v3440_v3 = vadd.f32 %v835_v51, %v626_v0  ;;  %v2723_v4 = vpop.f32.mrb[9].mxu0 }
  0xff   : > { %v629_v5 = vpop.f32.mrb[10].mxu0  ;;  %v843_v7 = vpop.f32.mrb[12].mxu1  ;;  %v1207_v4 = vsel %vm382_vm2, %v1202_v59, %v1206_v60 }
 0x100   : > { %v3443_v10 = vadd.f32 %v838_v57, %v629_v5  ;;  %v2724_v11 = vpop.f32.mrb[11].mxu0  ;;  %v2797_v12 = vpop.f32.mrb[13].mxu1  ;;  %v3074_v57 = vld [vmem:[%s3159_s23 + $0x90] ss:$0 sps:$4 sm:$0x11]  }
 0x101   : > { %v846_v13 = vpop.f32.mrb[14].mxu1  ;;  %v1631_v62 = vrot.slane %v3074_v57, 1 }
 0x102   : > { %2902 = vmatmul.mubr.msk.bf16.gmra.mrb[116].mxu0 %vm524_vm1, %v1183_v6  ;;  %v2798_v16 = vpop.f32.mrb[15].mxu1 }
 0x103   : > { %2905 = vmatprep.mubr.msk.bf16.mxu0 %vm3100_vm0, %v3099_v1  ;;  %v1632_v11 = vsel %vm1597_vm3, %v1629_v42, %v1631_v62 }
 0x104   : > { %2976 = vmatmul.mubr.msk.bf16.gmra.mrb[120].mxu1 %vm524_vm1, %v1626_v14 }
 0x105   : > { %v634_v20 = vpop.f32.mrb[12].mxu0  ;;  %2979 = vmatprep.mubr.msk.bf16.mxu1 %vm3100_vm0, %v3099_v1 }
 0x106   : > { %v3454_v22 = vadd.f32 %v843_v7, %v634_v20  ;;  %v2727_v23 = vpop.f32.mrb[13].mxu0 }
 0x107   : > { %v637_v24 = vpop.f32.mrb[14].mxu0  ;;  %v851_v26 = vpop.f32.mrb[16].mxu1 }
 0x108   : > { %v3457_v30 = vadd.f32 %v846_v13, %v637_v24  ;;  %v2728_v31 = vpop.f32.mrb[15].mxu0  ;;  %v2801_v32 = vpop.f32.mrb[17].mxu1  ;;  %v1208_v13 = vshrl.u32 %v3073_v40, 16 }
 0x109   : > { %v854_v33 = vpop.f32.mrb[18].mxu1 }
 0x10a   : > { %2906 = vmatmul.mubr.msk.bf16.gmra.mrb[120].mxu0 %vm524_vm1, %v1191_v25  ;;  %v2802_v37 = vpop.f32.mrb[19].mxu1  ;;  %v1210_v17 = vor.u32 %v1208_v13, %v1206_v60 }
 0x10b   : > { %2909 = vmatprep.mubr.msk.bf16.mxu0 %vm3100_vm0, %v3099_v1 }
 0x10c   : > { %2980 = vmatmul.mubr.msk.bf16.gmra.mrb[124].mxu1 %vm524_vm1, %v1628_v34 }
 0x10d   : > { %v642_v41 = vpop.f32.mrb[16].mxu0  ;;  %2983 = vmatprep.mubr.msk.bf16.mxu1 %vm3100_vm0, %v3099_v1 }
 0x10e   : > { %v3468_v43 = vadd.f32 %v851_v26, %v642_v41  ;;  %v2731_v44 = vpop.f32.mrb[17].mxu0 }
 0x10f   : > { %v645_v45 = vpop.f32.mrb[18].mxu0  ;;  %v859_v48 = vpop.f32.mrb[20].mxu1 }
 0x110   : > { %v3471_v51 = vadd.f32 %v854_v33, %v645_v45  ;;  %v2732_v52 = vpop.f32.mrb[19].mxu0  ;;  %v2805_v53 = vpop.f32.mrb[21].mxu1 }
 0x111   : > { %v862_v55 = vpop.f32.mrb[22].mxu1 }
 0x112   : > { %2910 = vmatmul.mubr.msk.bf16.gmra.mrb[124].mxu0 %vm524_vm1, %v1199_v46  ;;  %v2806_v58 = vpop.f32.mrb[23].mxu1 }
 0x113   : > { %2913 = vmatprep.mubr.msk.bf16.mxu0 %vm3100_vm0, %v3099_v1 }
 0x114   : > { %2984 = vmatmul.mubr.msk.bf16.gmra.mrb[128].mxu1 %vm524_vm1, %v1630_v56 }
 0x115   : > { %v650_v61 = vpop.f32.mrb[20].mxu0  ;;  %2987 = vmatprep.mubr.msk.bf16.mxu1 %vm3100_vm0, %v3099_v1 }
 0x116   : > { %v3481_v63 = vadd.f32 %v859_v48, %v650_v61  ;;  %v2735_v0 = vpop.f32.mrb[21].mxu0 }
 0x117   : > { %v653_v2 = vpop.f32.mrb[22].mxu0  ;;  %v867_v5 = vpop.f32.mrb[24].mxu1 }
 0x118   : > { %v3484_v6 = vadd.f32 %v862_v55, %v653_v2  ;;  %v2736_v7 = vpop.f32.mrb[23].mxu0  ;;  %v2809_v8 = vpop.f32.mrb[25].mxu1 }
 0x119   : > { %v870_v9 = vpop.f32.mrb[26].mxu1 }
 0x11a   : > { %2914 = vmatmul.mubr.msk.bf16.gmra.mrb[128].mxu0 %vm524_vm1, %v1207_v4  ;;  %v2810_v12 = vpop.f32.mrb[27].mxu1 }
 0x11b   : > { %2917 = vmatprep.mubr.msk.bf16.mxu0 %vm3100_vm0, %v3099_v1 }
 0x11c   : > { %2988 = vmatmul.mubr.msk.bf16.gmra.mrb[132].mxu1 %vm524_vm1, %v1632_v11 }
 0x11d   : > { %v658_v14 = vpop.f32.mrb[24].mxu0 }
 0x11e   : > { %v3491_v15 = vadd.f32 %v867_v5, %v658_v14  ;;  %v2739_v16 = vpop.f32.mrb[25].mxu0 }
 0x11f   : > { %v661_v18 = vpop.f32.mrb[26].mxu0  ;;  %v875_v19 = vpop.f32.mrb[28].mxu1 }
 0x120   : > { %v3493_v20 = vadd.f32 %v870_v9, %v661_v18  ;;  %v2740_v21 = vpop.f32.mrb[27].mxu0  ;;  %v2813_v23 = vpop.f32.mrb[29].mxu1 }
 0x121   : > { %v878_v24 = vpop.f32.mrb[30].mxu1 }
 0x122   : > { %2918 = vmatmul.mubr.msk.bf16.gmra.mrb[132].mxu0 %vm524_vm1, %v1210_v17  ;;  %v2814_v25 = vpop.f32.mrb[31].mxu1 }
 0x125   : > { %v666_v26 = vpop.f32.mrb[28].mxu0 }
 0x126   : > { %v3496_v27 = vadd.f32 %v875_v19, %v666_v26  ;;  %v2743_v1 = vpop.f32.mrb[29].mxu0 }
 0x127   : > { %v669_v29 = vpop.f32.mrb[30].mxu0  ;;  %v883_v31 = vpop.f32.mrb[32].mxu1 }
 0x128   : > { %v3498_v32 = vadd.f32 %v878_v24, %v669_v29  ;;  %v2744_v33 = vpop.f32.mrb[31].mxu0  ;;  %v2817_v34 = vpop.f32.mrb[33].mxu1 }
 0x129   : > { %v886_v36 = vpop.f32.mrb[34].mxu1 }
 0x12a   : > { %v2818_v37 = vpop.f32.mrb[35].mxu1 }
 0x12d   : > { %v674_v38 = vpop.f32.mrb[32].mxu0 }
 0x12e   : > { %v3500_v39 = vadd.f32 %v883_v31, %v674_v38  ;;  %v2747_v40 = vpop.f32.mrb[33].mxu0 }
 0x12f   : > { %v677_v41 = vpop.f32.mrb[34].mxu0  ;;  %v891_v42 = vpop.f32.mrb[36].mxu1 }
 0x130   : > { %v3502_v44 = vadd.f32 %v886_v36, %v677_v41  ;;  %v2748_v45 = vpop.f32.mrb[35].mxu0  ;;  %v2821_v46 = vpop.f32.mrb[37].mxu1 }
 0x131   : > { %v894_v48 = vpop.f32.mrb[38].mxu1 }
 0x132   : > { %v2822_v49 = vpop.f32.mrb[39].mxu1 }
 0x135   : > { %v682_v50 = vpop.f32.mrb[36].mxu0 }
 0x136   : > { %v3504_v52 = vadd.f32 %v891_v42, %v682_v50  ;;  %v2751_v53 = vpop.f32.mrb[37].mxu0 }
 0x137   : > { %v685_v55 = vpop.f32.mrb[38].mxu0  ;;  %v899_v56 = vpop.f32.mrb[40].mxu1 }
 0x138   : > { %v3506_v57 = vadd.f32 %v894_v48, %v685_v55  ;;  %v2752_v58 = vpop.f32.mrb[39].mxu0  ;;  %v2825_v59 = vpop.f32.mrb[41].mxu1 }
 0x139   : > { %v902_v60 = vpop.f32.mrb[42].mxu1 }
 0x13a   : > { %v2826_v61 = vpop.f32.mrb[43].mxu1 }
 0x13d   : > { %v690_v62 = vpop.f32.mrb[40].mxu0 }
 0x13e   : > { %v3508_v0 = vadd.f32 %v899_v56, %v690_v62  ;;  %v2755_v2 = vpop.f32.mrb[41].mxu0 }
 0x13f   : > { %v693_v4 = vpop.f32.mrb[42].mxu0  ;;  %v907_v5 = vpop.f32.mrb[44].mxu1 }
 0x140   : > { %v3510_v7 = vadd.f32 %v902_v60, %v693_v4  ;;  %v2756_v8 = vpop.f32.mrb[43].mxu0  ;;  %v2829_v9 = vpop.f32.mrb[45].mxu1 }
 0x141   : > { %v910_v11 = vpop.f32.mrb[46].mxu1 }
 0x142   : > { %v2830_v12 = vpop.f32.mrb[47].mxu1 }
 0x145   : > { %v698_v13 = vpop.f32.mrb[44].mxu0 }
 0x146   : > { %v3512_v14 = vadd.f32 %v907_v5, %v698_v13  ;;  %v2759_v16 = vpop.f32.mrb[45].mxu0 }
 0x147   : > { %v701_v17 = vpop.f32.mrb[46].mxu0  ;;  %v915_v18 = vpop.f32.mrb[48].mxu1 }
 0x148   : > { %v3514_v19 = vadd.f32 %v910_v11, %v701_v17  ;;  %v2760_v21 = vpop.f32.mrb[47].mxu0  ;;  %v2833_v23 = vpop.f32.mrb[49].mxu1 }
 0x149   : > { %v918_v24 = vpop.f32.mrb[50].mxu1 }
 0x14a   : > { %v2834_v25 = vpop.f32.mrb[51].mxu1 }
 0x14d   : > { %v706_v26 = vpop.f32.mrb[48].mxu0 }
 0x14e   : > { %v3516_v1 = vadd.f32 %v915_v18, %v706_v26  ;;  %v2763_v29 = vpop.f32.mrb[49].mxu0 }
 0x14f   : > { %v709_v31 = vpop.f32.mrb[50].mxu0  ;;  %v923_v33 = vpop.f32.mrb[52].mxu1 }
 0x150   : > { %v3518_v34 = vadd.f32 %v918_v24, %v709_v31  ;;  %v2764_v36 = vpop.f32.mrb[51].mxu0  ;;  %v2837_v37 = vpop.f32.mrb[53].mxu1 }
 0x151   : > { %v926_v38 = vpop.f32.mrb[54].mxu1 }
 0x152   : > { %v2838_v40 = vpop.f32.mrb[55].mxu1 }
 0x155   : > { %v714_v41 = vpop.f32.mrb[52].mxu0 }
 0x156   : > { %v3520_v42 = vadd.f32 %v923_v33, %v714_v41  ;;  %v2767_v45 = vpop.f32.mrb[53].mxu0 }
 0x157   : > { %v717_v46 = vpop.f32.mrb[54].mxu0  ;;  %v931_v48 = vpop.f32.mrb[56].mxu1 }
 0x158   : > { %v3522_v49 = vadd.f32 %v926_v38, %v717_v46  ;;  %v2768_v50 = vpop.f32.mrb[55].mxu0  ;;  %v2841_v53 = vpop.f32.mrb[57].mxu1 }
 0x159   : > { %v934_v55 = vpop.f32.mrb[58].mxu1  ;;  %v3540_v53 = vld [vmem:[%s3645_s2] ss:$0 sm:$0xff] }
 0x15a   : > { %v2842_v56 = vpop.f32.mrb[59].mxu1 }
 0x15d   : > { %v722_v58 = vpop.f32.mrb[56].mxu0 }
 0x15e   : > { %v3524_v59 = vadd.f32 %v931_v48, %v722_v58  ;;  %v2771_v60 = vpop.f32.mrb[57].mxu0 }
 0x15f   : > { %v725_v61 = vpop.f32.mrb[58].mxu0  ;;  %v939_v62 = vpop.f32.mrb[60].mxu1 }
 0x160   : > { %v3526_v2 = vadd.f32 %v934_v55, %v725_v61  ;;  %v2772_v4 = vpop.f32.mrb[59].mxu0  ;;  %v2845_v5 = vpop.f32.mrb[61].mxu1 }
 0x161   : > { %v942_v8 = vpop.f32.mrb[62].mxu1 }
 0x162   : > { %v2846_v9 = vpop.f32.mrb[63].mxu1 }
 0x165   : > { %v730_v11 = vpop.f32.mrb[60].mxu0 }
 0x166   : > { %v3528_v12 = vadd.f32 %v939_v62, %v730_v11  ;;  %v2775_v13 = vpop.f32.mrb[61].mxu0 }
 0x167   : > { %v733_v16 = vpop.f32.mrb[62].mxu0  ;;  %v947_v17 = vpop.f32.mrb[64].mxu1 }
 0x168   : > { %v3530_v18 = vadd.f32 %v942_v8, %v733_v16  ;;  %v2776_v21 = vpop.f32.mrb[63].mxu0  ;;  %v2849_v23 = vpop.f32.mrb[65].mxu1 }
 0x169   : > { %v950_v24 = vpop.f32.mrb[66].mxu1 }
 0x16a   : > { %v2850_v25 = vpop.f32.mrb[67].mxu1 }
 0x16d   : > { %v738_v26 = vpop.f32.mrb[64].mxu0 }
 0x16e   : > { %v3532_v29 = vadd.f32 %v947_v17, %v738_v26  ;;  %v2779_v31 = vpop.f32.mrb[65].mxu0 }
 0x16f   : > { %v741_v33 = vpop.f32.mrb[66].mxu0  ;;  %v1724_v36 = vpop.f32.mrb[68].mxu1 }
 0x170   : > { %v3534_v37 = vadd.f32 %v950_v24, %v741_v33  ;;  %v2780_v38 = vpop.f32.mrb[67].mxu0  ;;  %v2925_v40 = vpop.f32.mrb[69].mxu1 }
 0x171   : > { %v1727_v41 = vpop.f32.mrb[70].mxu1 }
 0x172   : > { %v2926_v45 = vpop.f32.mrb[71].mxu1 }
 0x175   : > { %v1302_v46 = vpop.f32.mrb[68].mxu0 }
 0x176   : > { %v1437_v48 = vadd.f32 %v1302_v46, %v3412_v28  ;;  %v2855_v50 = vpop.f32.mrb[69].mxu0 }
 0x177   : > { %v1305_v55 = vpop.f32.mrb[70].mxu0  ;;  %v1732_v56 = vpop.f32.mrb[72].mxu1 }
 0x178   : > { %v1859_v58 = vadd.f32 %v1724_v36, %v1437_v48  ;;  %v1438_v60 = vadd.f32 %v1305_v55, %v3415_v35  ;;  %v2856_v61 = vpop.f32.mrb[71].mxu0  ;;  %v2929_v62 = vpop.f32.mrb[73].mxu1 }
 0x179   : > { %v1735_v4 = vpop.f32.mrb[74].mxu1 }
 0x17a   : > { %v1900_v5 = vadd.f32 %v3540_v53, %v1859_v58  ;;  %v1860_v8 = vadd.f32 %v1727_v41, %v1438_v60  ;;  %v2930_v9 = vpop.f32.mrb[75].mxu1 }
 0x17c   : > { %v1968_v11 = vmul.f32 0.2, %v1900_v5  ;;  %v1901_v28 = vadd.f32 %v3540_v53, %v1860_v8  ;;  %vm1934_vm4 = vcmp.ge.f32.partialorder %v1900_v5, 0.0 }
 0x17d   : > { %v1310_v13 = vpop.f32.mrb[72].mxu0 }
 0x17e   : > { %vm1935_vm5 = vcmp.ge.f32.partialorder %v1901_v28, 0.0  ;;  %v1969_v16 = vmul.f32 0.2, %v1901_v28  ;;  %v1439_v17 = vadd.f32 %v1310_v13, %v3426_v47  ;;  %v2859_v21 = vpop.f32.mrb[73].mxu0  ;;  %v2002_v24 = vsel %vm1934_vm4, %v1900_v5, %v1968_v11 }
 0x17f   : > { %v1313_v23 = vpop.f32.mrb[74].mxu0  ;;  %v1740_v35 = vpop.f32.mrb[76].mxu1 }
 0x180   : > { %v2003_v25 = vsel %vm1935_vm5, %v1901_v28, %v1969_v16  ;;  %v1861_v26 = vadd.f32 %v1732_v56, %v1439_v17  ;;  %v1440_v31 = vadd.f32 %v1313_v23, %v3429_v54  ;;  %v2860_v33 = vpop.f32.mrb[75].mxu0  ;;  %v2933_v36 = vpop.f32.mrb[77].mxu1 }
 0x181   : > { %v2547_v38 = vpack.c.bf16 %v2003_v25, %v2002_v24  ;;  %v1743_v40 = vpop.f32.mrb[78].mxu1 }
 0x182   : > { %v1902_v47 = vadd.f32 %v3540_v53, %v1861_v26  ;;  %v1862_v41 = vadd.f32 %v1735_v4, %v1440_v31  ;;  %v2934_v45 = vpop.f32.mrb[79].mxu1 }
 0x183   : > { %2548 = vst [vmem:[%s3550_s6] sm:$0xff] %v2547_v38  }
 0x184   : > { %v1970_v46 = vmul.f32 0.2, %v1902_v47  ;;  %v1903_v48 = vadd.f32 %v3540_v53, %v1862_v41  ;;  %vm1936_vm6 = vcmp.ge.f32.partialorder %v1902_v47, 0.0 }
 0x185   : > { %v1318_v50 = vpop.f32.mrb[76].mxu0 }
 0x186   : > { %vm1937_vm7 = vcmp.ge.f32.partialorder %v1903_v48, 0.0  ;;  %v1971_v55 = vmul.f32 0.2, %v1903_v48  ;;  %v1441_v56 = vadd.f32 %v1318_v50, %v3440_v3  ;;  %v2863_v54 = vpop.f32.mrb[77].mxu0  ;;  %v2004_v61 = vsel %vm1936_vm6, %v1902_v47, %v1970_v46 }
 0x187   : > { %v1321_v58 = vpop.f32.mrb[78].mxu0  ;;  %v1748_v60 = vpop.f32.mrb[80].mxu1 }
 0x188   : > { %v2005_v62 = vsel %vm1937_vm7, %v1903_v48, %v1971_v55  ;;  %v1863_v5 = vadd.f32 %v1740_v35, %v1441_v56  ;;  %v1442_v4 = vadd.f32 %v1321_v58, %v3443_v10  ;;  %v2864_v8 = vpop.f32.mrb[79].mxu0  ;;  %v2937_v9 = vpop.f32.mrb[81].mxu1 }
 0x189   : > { %v2552_v11 = vpack.c.bf16 %v2005_v62, %v2004_v61  ;;  %v1751_v28 = vpop.f32.mrb[82].mxu1 }
 0x18a   : > { %v1904_v13 = vadd.f32 %v3540_v53, %v1863_v5  ;;  %v1864_v16 = vadd.f32 %v1743_v40, %v1442_v4  ;;  %v2938_v17 = vpop.f32.mrb[83].mxu1 }
 0x18b   : > { %2624 = vst [vmem:[%s3550_s6 + $0x8] sm:$0xff] %v2552_v11  }
 0x18c   : > { %v1972_v21 = vmul.f32 0.2, %v1904_v13  ;;  %v1905_v3 = vadd.f32 %v3540_v53, %v1864_v16  ;;  %vm1938_vm8 = vcmp.ge.f32.partialorder %v1904_v13, 0.0 }
 0x18d   : > { %v1326_v23 = vpop.f32.mrb[80].mxu0 }
 0x18e   : > { %vm1939_vm9 = vcmp.ge.f32.partialorder %v1905_v3, 0.0  ;;  %v1973_v24 = vmul.f32 0.2, %v1905_v3  ;;  %v1443_v35 = vadd.f32 %v1326_v23, %v3454_v22  ;;  %v2867_v10 = vpop.f32.mrb[81].mxu0  ;;  %v2006_v31 = vsel %vm1938_vm8, %v1904_v13, %v1972_v21 }
 0x18f   : > { %v1329_v25 = vpop.f32.mrb[82].mxu0  ;;  %v1756_v26 = vpop.f32.mrb[84].mxu1 }
 0x190   : > { %v2007_v33 = vsel %vm1939_vm9, %v1905_v3, %v1973_v24  ;;  %v1865_v36 = vadd.f32 %v1748_v60, %v1443_v35  ;;  %v1444_v38 = vadd.f32 %v1329_v25, %v3457_v30  ;;  %v2868_v40 = vpop.f32.mrb[83].mxu0  ;;  %v2941_v47 = vpop.f32.mrb[85].mxu1 }
 0x191   : > { %v2557_v41 = vpack.c.bf16 %v2007_v33, %v2006_v31  ;;  %v1759_v45 = vpop.f32.mrb[86].mxu1 }
 0x192   : > { %v1906_v46 = vadd.f32 %v3540_v53, %v1865_v36  ;;  %v1866_v48 = vadd.f32 %v1751_v28, %v1444_v38  ;;  %v2942_v50 = vpop.f32.mrb[87].mxu1 }
 0x193   : > { %2625 = vst [vmem:[%s3550_s6 + $0x10] sm:$0xff] %v2557_v41  }
 0x194   : > { %v1974_v55 = vmul.f32 0.2, %v1906_v46  ;;  %v1907_v22 = vadd.f32 %v3540_v53, %v1866_v48  ;;  %vm1940_vm10 = vcmp.ge.f32.partialorder %v1906_v46, 0.0 }
 0x195   : > { %v1334_v56 = vpop.f32.mrb[84].mxu0 }
 0x196   : > { %vm1941_vm11 = vcmp.ge.f32.partialorder %v1907_v22, 0.0  ;;  %v1975_v54 = vmul.f32 0.2, %v1907_v22  ;;  %v1445_v58 = vadd.f32 %v1334_v56, %v3468_v43  ;;  %v2871_v30 = vpop.f32.mrb[85].mxu0  ;;  %v2008_v62 = vsel %vm1940_vm10, %v1906_v46, %v1974_v55 }
 0x197   : > { %v1337_v60 = vpop.f32.mrb[86].mxu0  ;;  %v1764_v61 = vpop.f32.mrb[88].mxu1 }
 0x198   : > { %v2009_v5 = vsel %vm1941_vm11, %v1907_v22, %v1975_v54  ;;  %v1867_v4 = vadd.f32 %v1756_v26, %v1445_v58  ;;  %v1446_v8 = vadd.f32 %v1337_v60, %v3471_v51  ;;  %v2872_v9 = vpop.f32.mrb[87].mxu0  ;;  %v2945_v11 = vpop.f32.mrb[89].mxu1 }
 0x199   : > { %v2562_v28 = vpack.c.bf16 %v2009_v5, %v2008_v62  ;;  %v1767_v13 = vpop.f32.mrb[90].mxu1 }
 0x19a   : > { %v1908_v16 = vadd.f32 %v3540_v53, %v1867_v4  ;;  %v1868_v17 = vadd.f32 %v1759_v45, %v1446_v8  ;;  %v2946_v21 = vpop.f32.mrb[91].mxu1 }
 0x19b   : > { %2626 = vst [vmem:[%s3550_s6 + $0x18] sm:$0xff] %v2562_v28  }
 0x19c   : > { %v1976_v3 = vmul.f32 0.2, %v1908_v16  ;;  %v1909_v43 = vadd.f32 %v3540_v53, %v1868_v17  ;;  %vm1942_vm12 = vcmp.ge.f32.partialorder %v1908_v16, 0.0 }
 0x19d   : > { %v1342_v23 = vpop.f32.mrb[88].mxu0 }
 0x19e   : > { %vm1943_vm13 = vcmp.ge.f32.partialorder %v1909_v43, 0.0  ;;  %v1977_v24 = vmul.f32 0.2, %v1909_v43  ;;  %v1447_v35 = vadd.f32 %v1342_v23, %v3481_v63  ;;  %v2875_v51 = vpop.f32.mrb[89].mxu0  ;;  %v2010_v26 = vsel %vm1942_vm12, %v1908_v16, %v1976_v3 }
 0x19f   : > { %v1345_v10 = vpop.f32.mrb[90].mxu0  ;;  %v1772_v25 = vpop.f32.mrb[92].mxu1 }
 0x1a0   : > { %v2011_v31 = vsel %vm1943_vm13, %v1909_v43, %v1977_v24  ;;  %v1869_v33 = vadd.f32 %v1764_v61, %v1447_v35  ;;  %v1448_v36 = vadd.f32 %v1345_v10, %v3484_v6  ;;  %v2876_v38 = vpop.f32.mrb[91].mxu0  ;;  %v2949_v40 = vpop.f32.mrb[93].mxu1 }
 0x1a1   : > { %v2567_v47 = vpack.c.bf16 %v2011_v31, %v2010_v26  ;;  %v1775_v41 = vpop.f32.mrb[94].mxu1 }
 0x1a2   : > { %v1910_v45 = vadd.f32 %v3540_v53, %v1869_v33  ;;  %v1870_v46 = vadd.f32 %v1767_v13, %v1448_v36  ;;  %v2950_v48 = vpop.f32.mrb[95].mxu1 }
 0x1a3   : > { %2627 = vst [vmem:[%s3550_s6 + $0x20] sm:$0xff] %v2567_v47  }
 0x1a4   : > { %v1978_v50 = vmul.f32 0.2, %v1910_v45  ;;  %v1911_v63 = vadd.f32 %v3540_v53, %v1870_v46  ;;  %vm1944_vm14 = vcmp.ge.f32.partialorder %v1910_v45, 0.0 }
 0x1a5   : > { %v1350_v55 = vpop.f32.mrb[92].mxu0 }
 0x1a6   : > { %vm1945_vm15 = vcmp.ge.f32.partialorder %v1911_v63, 0.0  ;;  %v1979_v22 = vmul.f32 0.2, %v1911_v63  ;;  %v1449_v56 = vadd.f32 %v1350_v55, %v3491_v15  ;;  %v2879_v6 = vpop.f32.mrb[93].mxu0  ;;  %v2012_v30 = vsel %vm1944_vm14, %v1910_v45, %v1978_v50 }
 0x1a7   : > { %v1353_v54 = vpop.f32.mrb[94].mxu0  ;;  %v1780_v58 = vpop.f32.mrb[96].mxu1 }
 0x1a8   : > { %v2013_v60 = vsel %vm1945_vm15, %v1911_v63, %v1979_v22  ;;  %v1871_v61 = vadd.f32 %v1772_v25, %v1449_v56  ;;  %v1450_v62 = vadd.f32 %v1353_v54, %v3493_v20  ;;  %v2880_v5 = vpop.f32.mrb[95].mxu0  ;;  %v2953_v4 = vpop.f32.mrb[97].mxu1 }
 0x1a9   : > { %v2572_v8 = vpack.c.bf16 %v2013_v60, %v2012_v30  ;;  %v1783_v9 = vpop.f32.mrb[98].mxu1 }
 0x1aa   : > { %v1912_v11 = vadd.f32 %v3540_v53, %v1871_v61  ;;  %v1872_v28 = vadd.f32 %v1775_v41, %v1450_v62  ;;  %v2954_v13 = vpop.f32.mrb[99].mxu1 }
 0x1ab   : > { %2628 = vst [vmem:[%s3550_s6 + $0x28] sm:$0xff] %v2572_v8  }
 0x1ac   : > { %v1980_v16 = vmul.f32 0.2, %v1912_v11  ;;  %v1913_v15 = vadd.f32 %v3540_v53, %v1872_v28  ;;  %vm1946_vm0 = vcmp.ge.f32.partialorder %v1912_v11, 0.0 }
 0x1ad   : > { %v1358_v17 = vpop.f32.mrb[96].mxu0 }
 0x1ae   : > { %vm1947_vm1 = vcmp.ge.f32.partialorder %v1913_v15, 0.0  ;;  %v1981_v21 = vmul.f32 0.2, %v1913_v15  ;;  %v1451_v3 = vadd.f32 %v1358_v17, %v3496_v27  ;;  %v2883_v20 = vpop.f32.mrb[97].mxu0  ;;  %v2014_v24 = vsel %vm1946_vm0, %v1912_v11, %v1980_v16 }
 0x1af   : > { %v1361_v43 = vpop.f32.mrb[98].mxu0  ;;  %v1788_v23 = vpop.f32.mrb[100].mxu1 }
 0x1b0   : > { %v2015_v35 = vsel %vm1947_vm1, %v1913_v15, %v1981_v21  ;;  %v1873_v51 = vadd.f32 %v1780_v58, %v1451_v3  ;;  %v1452_v10 = vadd.f32 %v1361_v43, %v3498_v32  ;;  %v2884_v25 = vpop.f32.mrb[99].mxu0  ;;  %v2957_v26 = vpop.f32.mrb[101].mxu1 }
 0x1b1   : > { %v2577_v31 = vpack.c.bf16 %v2015_v35, %v2014_v24  ;;  %v1791_v33 = vpop.f32.mrb[102].mxu1 }
 0x1b2   : > { %v1914_v36 = vadd.f32 %v3540_v53, %v1873_v51  ;;  %v1874_v38 = vadd.f32 %v1783_v9, %v1452_v10  ;;  %v2958_v40 = vpop.f32.mrb[103].mxu1 }
 0x1b3   : > { %2629 = vst [vmem:[%s3550_s6 + $0x30] sm:$0xff] %v2577_v31  }
 0x1b4   : > { %v1982_v47 = vmul.f32 0.2, %v1914_v36  ;;  %v1915_v27 = vadd.f32 %v3540_v53, %v1874_v38  ;;  %vm1948_vm2 = vcmp.ge.f32.partialorder %v1914_v36, 0.0 }
 0x1b5   : > { %v1366_v41 = vpop.f32.mrb[100].mxu0 }
 0x1b6   : > { %vm1949_vm3 = vcmp.ge.f32.partialorder %v1915_v27, 0.0  ;;  %v1983_v45 = vmul.f32 0.2, %v1915_v27  ;;  %v1453_v46 = vadd.f32 %v1366_v41, %v3500_v39  ;;  %v2887_v32 = vpop.f32.mrb[101].mxu0  ;;  %v2016_v63 = vsel %vm1948_vm2, %v1914_v36, %v1982_v47 }
 0x1b7   : > { %v1369_v48 = vpop.f32.mrb[102].mxu0  ;;  %v1796_v50 = vpop.f32.mrb[104].mxu1 }
 0x1b8   : > { %v2017_v55 = vsel %vm1949_vm3, %v1915_v27, %v1983_v45  ;;  %v1875_v22 = vadd.f32 %v1788_v23, %v1453_v46  ;;  %v1454_v56 = vadd.f32 %v1369_v48, %v3502_v44  ;;  %v2888_v6 = vpop.f32.mrb[103].mxu0  ;;  %v2961_v54 = vpop.f32.mrb[105].mxu1 }
 0x1b9   : > { %v2582_v58 = vpack.c.bf16 %v2017_v55, %v2016_v63  ;;  %v1799_v30 = vpop.f32.mrb[106].mxu1 }
 0x1ba   : > { %v1916_v60 = vadd.f32 %v3540_v53, %v1875_v22  ;;  %v1876_v61 = vadd.f32 %v1791_v33, %v1454_v56  ;;  %v2962_v62 = vpop.f32.mrb[107].mxu1 }
 0x1bb   : > { %2630 = vst [vmem:[%s3550_s6 + $0x38] sm:$0xff] %v2582_v58  }
 0x1bc   : > { %v1984_v5 = vmul.f32 0.2, %v1916_v60  ;;  %v1917_v39 = vadd.f32 %v3540_v53, %v1876_v61  ;;  %vm1950_vm4 = vcmp.ge.f32.partialorder %v1916_v60, 0.0 }
 0x1bd   : > { %v1374_v4 = vpop.f32.mrb[104].mxu0 }
 0x1be   : > { %vm1951_vm5 = vcmp.ge.f32.partialorder %v1917_v39, 0.0  ;;  %v1985_v8 = vmul.f32 0.2, %v1917_v39  ;;  %v1455_v9 = vadd.f32 %v1374_v4, %v3504_v52  ;;  %v2891_v44 = vpop.f32.mrb[105].mxu0  ;;  %v2018_v13 = vsel %vm1950_vm4, %v1916_v60, %v1984_v5 }
 0x1bf   : > { %v1377_v11 = vpop.f32.mrb[106].mxu0  ;;  %v1804_v28 = vpop.f32.mrb[108].mxu1 }
 0x1c0   : > { %v2019_v16 = vsel %vm1951_vm5, %v1917_v39, %v1985_v8  ;;  %v1877_v15 = vadd.f32 %v1796_v50, %v1455_v9  ;;  %v1456_v17 = vadd.f32 %v1377_v11, %v3506_v57  ;;  %v2892_v21 = vpop.f32.mrb[107].mxu0  ;;  %v2965_v3 = vpop.f32.mrb[109].mxu1  ;;  %vm2205_vm5 = vcmask 1043456  }
 0x1c1   : > { %v2587_v20 = vpack.c.bf16 %v2019_v16, %v2018_v13  ;;  %v1807_v43 = vpop.f32.mrb[110].mxu1 }
 0x1c2   : > { %v1918_v23 = vadd.f32 %v3540_v53, %v1877_v15  ;;  %v1878_v24 = vadd.f32 %v1799_v30, %v1456_v17  ;;  %v2966_v35 = vpop.f32.mrb[111].mxu1 }
 0x1c3   : > { %2631 = vst [vmem:[%s3550_s6 + $0x40] sm:$0xff] %v2587_v20  }
 0x1c4   : > { %v1986_v51 = vmul.f32 0.2, %v1918_v23  ;;  %v1919_v52 = vadd.f32 %v3540_v53, %v1878_v24  ;;  %vm1952_vm6 = vcmp.ge.f32.partialorder %v1918_v23, 0.0 }
 0x1c5   : > { %v1382_v10 = vpop.f32.mrb[108].mxu0 }
 0x1c6   : > { %vm1953_vm7 = vcmp.ge.f32.partialorder %v1919_v52, 0.0  ;;  %v1987_v25 = vmul.f32 0.2, %v1919_v52  ;;  %v1457_v26 = vadd.f32 %v1382_v10, %v3508_v0  ;;  %v2895_v57 = vpop.f32.mrb[109].mxu0  ;;  %v2020_v36 = vsel %vm1952_vm6, %v1918_v23, %v1986_v51 }
 0x1c7   : > { %v1385_v31 = vpop.f32.mrb[110].mxu0  ;;  %v1812_v33 = vpop.f32.mrb[112].mxu1  ;;  %vm2206_vm6 = vsmask.f32 3328 }
 0x1c8   : > { %v2021_v38 = vsel %vm1953_vm7, %v1919_v52, %v1987_v25  ;;  %v1879_v40 = vadd.f32 %v1804_v28, %v1457_v26  ;;  %v1458_v47 = vadd.f32 %v1385_v31, %v3510_v7  ;;  %v2896_v27 = vpop.f32.mrb[111].mxu0  ;;  %v2969_v41 = vpop.f32.mrb[113].mxu1 }
 0x1c9   : > { %v2592_v45 = vpack.c.bf16 %v2021_v38, %v2020_v36  ;;  %v1815_v46 = vpop.f32.mrb[114].mxu1 }
 0x1ca   : > { %v1920_v32 = vadd.f32 %v3540_v53, %v1879_v40  ;;  %v1880_v48 = vadd.f32 %v1807_v43, %v1458_v47  ;;  %v2970_v50 = vpop.f32.mrb[115].mxu1 }
 0x1cb   : > { %2632 = vst [vmem:[%s3550_s6 + $0x48] sm:$0xff] %v2592_v45  }
 0x1cc   : > { %v1988_v63 = vmul.f32 0.2, %v1920_v32  ;;  %v1921_v0 = vadd.f32 %v3540_v53, %v1880_v48  ;;  %vm1954_vm8 = vcmp.ge.f32.partialorder %v1920_v32, 0.0 }
 0x1cd   : > { %v1390_v55 = vpop.f32.mrb[112].mxu0 }
 0x1ce   : > { %vm1955_vm9 = vcmp.ge.f32.partialorder %v1921_v0, 0.0  ;;  %v1989_v22 = vmul.f32 0.2, %v1921_v0  ;;  %v1459_v56 = vadd.f32 %v1390_v55, %v3512_v14  ;;  %v2899_v7 = vpop.f32.mrb[113].mxu0  ;;  %v2022_v58 = vsel %vm1954_vm8, %v1920_v32, %v1988_v63  ;;  %vm2207_vm8 = vmand %vm2205_vm5, %vm2206_vm6 }
 0x1cf   : > { %v1393_v6 = vpop.f32.mrb[114].mxu0  ;;  %v1820_v54 = vpop.f32.mrb[116].mxu1 }
 0x1d0   : > { %v2023_v30 = vsel %vm1955_vm9, %v1921_v0, %v1989_v22  ;;  %v1881_v60 = vadd.f32 %v1812_v33, %v1459_v56  ;;  %v1460_v61 = vadd.f32 %v1393_v6, %v3514_v19  ;;  %v2900_v62 = vpop.f32.mrb[115].mxu0  ;;  %v2973_v5 = vpop.f32.mrb[117].mxu1 }
 0x1d1   : > { %v2597_v39 = vpack.c.bf16 %v2023_v30, %v2022_v58  ;;  %v1823_v4 = vpop.f32.mrb[118].mxu1 }
 0x1d2   : > { %v1922_v8 = vadd.f32 %v3540_v53, %v1881_v60  ;;  %v1882_v9 = vadd.f32 %v1815_v46, %v1460_v61  ;;  %v2974_v44 = vpop.f32.mrb[119].mxu1 }
 0x1d3   : > { %2633 = vst [vmem:[%s3550_s6 + $0x50] sm:$0xff] %v2597_v39  }
 0x1d4   : > { %v1990_v11 = vmul.f32 0.2, %v1922_v8  ;;  %v1923_v14 = vadd.f32 %v3540_v53, %v1882_v9  ;;  %vm1956_vm10 = vcmp.ge.f32.partialorder %v1922_v8, 0.0 }
 0x1d5   : > { %v1398_v28 = vpop.f32.mrb[116].mxu0 }
 0x1d6   : > { %vm1957_vm11 = vcmp.ge.f32.partialorder %v1923_v14, 0.0  ;;  %v1991_v13 = vmul.f32 0.2, %v1923_v14  ;;  %v1461_v16 = vadd.f32 %v1398_v28, %v3516_v1  ;;  %v2903_v19 = vpop.f32.mrb[117].mxu0  ;;  %v2024_v21 = vsel %vm1956_vm10, %v1922_v8, %v1990_v11 }
 0x1d7   : > { %v1401_v15 = vpop.f32.mrb[118].mxu0  ;;  %v1828_v17 = vpop.f32.mrb[120].mxu1 }
 0x1d8   : > { %v2025_v3 = vsel %vm1957_vm11, %v1923_v14, %v1991_v13  ;;  %v1883_v20 = vadd.f32 %v1820_v54, %v1461_v16  ;;  %v1462_v43 = vadd.f32 %v1401_v15, %v3518_v34  ;;  %v2904_v23 = vpop.f32.mrb[119].mxu0  ;;  %v2977_v24 = vpop.f32.mrb[121].mxu1 }
 0x1d9   : > { %v2602_v35 = vpack.c.bf16 %v2025_v3, %v2024_v21  ;;  %v1831_v51 = vpop.f32.mrb[122].mxu1 }
 0x1da   : > { %v1924_v52 = vadd.f32 %v3540_v53, %v1883_v20  ;;  %v1884_v10 = vadd.f32 %v1823_v4, %v1462_v43  ;;  %v2978_v25 = vpop.f32.mrb[123].mxu1 }
 0x1db   : > { %2634 = vst [vmem:[%s3550_s6 + $0x58] sm:$0xff] %v2602_v35  }
 0x1dc   : > { %v1992_v26 = vmul.f32 0.2, %v1924_v52  ;;  %v1925_v1 = vadd.f32 %v3540_v53, %v1884_v10  ;;  %vm1958_vm12 = vcmp.ge.f32.partialorder %v1924_v52, 0.0 }
 0x1dd   : > { %v1406_v57 = vpop.f32.mrb[120].mxu0 }
 0x1de   : > { %vm1959_vm13 = vcmp.ge.f32.partialorder %v1925_v1, 0.0  ;;  %v1993_v31 = vmul.f32 0.2, %v1925_v1  ;;  %v1463_v33 = vadd.f32 %v1406_v57, %v3520_v42  ;;  %v2907_v34 = vpop.f32.mrb[121].mxu0  ;;  %v2026_v40 = vsel %vm1958_vm12, %v1924_v52, %v1992_v26 }
 0x1df   : > { %v1409_v36 = vpop.f32.mrb[122].mxu0  ;;  %v1836_v38 = vpop.f32.mrb[124].mxu1 }
 0x1e0   : > { %v2027_v47 = vsel %vm1959_vm13, %v1925_v1, %v1993_v31  ;;  %v1885_v27 = vadd.f32 %v1828_v17, %v1463_v33  ;;  %v1464_v41 = vadd.f32 %v1409_v36, %v3522_v49  ;;  %v2908_v45 = vpop.f32.mrb[123].mxu0  ;;  %v2981_v46 = vpop.f32.mrb[125].mxu1 }
 0x1e1   : > { %v2607_v32 = vpack.c.bf16 %v2027_v47, %v2026_v40  ;;  %v1839_v48 = vpop.f32.mrb[126].mxu1 }
 0x1e2   : > { %v1926_v50 = vadd.f32 %v3540_v53, %v1885_v27  ;;  %v1886_v63 = vadd.f32 %v1831_v51, %v1464_v41  ;;  %v2982_v0 = vpop.f32.mrb[127].mxu1 }
 0x1e3   : > { %2635 = vst [vmem:[%s3550_s6 + $0x60] sm:$0xff] %v2607_v32  }
 0x1e4   : > { %v1994_v55 = vmul.f32 0.2, %v1926_v50  ;;  %v1927_v42 = vadd.f32 %v3540_v53, %v1886_v63  ;;  %vm1960_vm14 = vcmp.ge.f32.partialorder %v1926_v50, 0.0 }
 0x1e5   : > { %v1414_v22 = vpop.f32.mrb[124].mxu0 }
 0x1e6   : > { %vm1961_vm15 = vcmp.ge.f32.partialorder %v1927_v42, 0.0  ;;  %v1995_v56 = vmul.f32 0.2, %v1927_v42  ;;  %v1465_v7 = vadd.f32 %v1414_v22, %v3524_v59  ;;  %v2911_v49 = vpop.f32.mrb[125].mxu0  ;;  %v2028_v58 = vsel %vm1960_vm14, %v1926_v50, %v1994_v55 }
 0x1e7   : > { %v1417_v6 = vpop.f32.mrb[126].mxu0  ;;  %v1844_v54 = vpop.f32.mrb[128].mxu1 }
 0x1e8   : > { %v2029_v30 = vsel %vm1961_vm15, %v1927_v42, %v1995_v56  ;;  %v1887_v60 = vadd.f32 %v1836_v38, %v1465_v7  ;;  %v1466_v61 = vadd.f32 %v1417_v6, %v3526_v2  ;;  %v2912_v62 = vpop.f32.mrb[127].mxu0  ;;  %v2985_v5 = vpop.f32.mrb[129].mxu1 }
 0x1e9   : > { %v2612_v39 = vpack.c.bf16 %v2029_v30, %v2028_v58  ;;  %v1847_v4 = vpop.f32.mrb[130].mxu1 }
 0x1ea   : > { %v1928_v8 = vadd.f32 %v3540_v53, %v1887_v60  ;;  %v1888_v9 = vadd.f32 %v1839_v48, %v1466_v61  ;;  %v2986_v44 = vpop.f32.mrb[131].mxu1  ;;  %v2208_v48 = vld [vmem:[%s3550_s6 + $0x84] sm:$0xf] }
 0x1eb   : > { %2636 = vst [vmem:[%s3550_s6 + $0x68] sm:$0xff] %v2612_v39  }
 0x1ec   : > { %v1996_v11 = vmul.f32 0.2, %v1928_v8  ;;  %v1929_v59 = vadd.f32 %v3540_v53, %v1888_v9  ;;  %vm1962_vm0 = vcmp.ge.f32.partialorder %v1928_v8, 0.0 }
 0x1ed   : > { %v1422_v14 = vpop.f32.mrb[128].mxu0 }
 0x1ee   : > { %vm1963_vm1 = vcmp.ge.f32.partialorder %v1929_v59, 0.0  ;;  %v1997_v28 = vmul.f32 0.2, %v1929_v59  ;;  %v1467_v13 = vadd.f32 %v1422_v14, %v3528_v12  ;;  %v2915_v2 = vpop.f32.mrb[129].mxu0  ;;  %v2030_v15 = vsel %vm1962_vm0, %v1928_v8, %v1996_v11 }
 0x1ef   : > { %v1425_v16 = vpop.f32.mrb[130].mxu0  ;;  %v1852_v19 = vpop.f32.mrb[132].mxu1 }
 0x1f0   : > { %v2031_v17 = vsel %vm1963_vm1, %v1929_v59, %v1997_v28  ;;  %v1889_v21 = vadd.f32 %v1844_v54, %v1467_v13  ;;  %v1468_v3 = vadd.f32 %v1425_v16, %v3530_v18  ;;  %v2916_v20 = vpop.f32.mrb[131].mxu0  ;;  %v2989_v43 = vpop.f32.mrb[133].mxu1 }
 0x1f1   : > { %v2617_v23 = vpack.c.bf16 %v2031_v17, %v2030_v15  ;;  %v1855_v24 = vpop.f32.mrb[134].mxu1 }
 0x1f2   : > { %v1930_v35 = vadd.f32 %v3540_v53, %v1889_v21  ;;  %v1890_v51 = vadd.f32 %v1847_v4, %v1468_v3  ;;  %v2990_v52 = vpop.f32.mrb[135].mxu1 }
 0x1f3   : > { %2637 = vst [vmem:[%s3550_s6 + $0x70] sm:$0xff] %v2617_v23  }
 0x1f4   : > { %v1998_v10 = vmul.f32 0.2, %v1930_v35  ;;  %v1931_v12 = vadd.f32 %v3540_v53, %v1890_v51  ;;  %vm1964_vm2 = vcmp.ge.f32.partialorder %v1930_v35, 0.0 }
 0x1f5   : > { %v1430_v25 = vpop.f32.mrb[132].mxu0 }
 0x1f6   : > { %vm1965_vm3 = vcmp.ge.f32.partialorder %v1931_v12, 0.0  ;;  %v1999_v26 = vmul.f32 0.2, %v1931_v12  ;;  %v1469_v1 = vadd.f32 %v1430_v25, %v3532_v29  ;;  %v2919_v18 = vpop.f32.mrb[133].mxu0  ;;  %v2032_v31 = vsel %vm1964_vm2, %v1930_v35, %v1998_v10 }
 0x1f7   : > { %v1433_v57 = vpop.f32.mrb[134].mxu0 }
 0x1f8   : > { %v2033_v33 = vsel %vm1965_vm3, %v1931_v12, %v1999_v26  ;;  %v1891_v34 = vadd.f32 %v1852_v19, %v1469_v1  ;;  %v1470_v36 = vadd.f32 %v1433_v57, %v3534_v37  ;;  %v2920_v38 = vpop.f32.mrb[135].mxu0 }
 0x1f9   : > { %v2622_v40 = vpack.c.bf16 %v2033_v33, %v2032_v31 }
 0x1fa   : > { %v1932_v47 = vadd.f32 %v3540_v53, %v1891_v34  ;;  %v1892_v27 = vadd.f32 %v1855_v24, %v1470_v36 }
 0x1fb   : > { %2638 = vst [vmem:[%s3550_s6 + $0x78] sm:$0xff] %v2622_v40  }
 0x1fc   : > { %vm1966_vm4 = vcmp.ge.f32.partialorder %v1932_v47, 0.0  ;;  %v2000_v41 = vmul.f32 0.2, %v1932_v47  ;;  %v1933_v29 = vadd.f32 %v3540_v53, %v1892_v27 }
 0x1fe   : > { %v2034_v45 = vsel %vm1966_vm4, %v1932_v47, %v2000_v41  ;;  %vm1967_vm7 = vcmp.ge.f32.partialorder %v1933_v29, 0.0  ;;  %v2001_v46 = vmul.f32 0.2, %v1933_v29 }
 0x1ff   : > { %v2542_v32 = vpack.c.bf16 %v2034_v45, %v2034_v45 }
 0x200   : > { %v2035_v37 = vsel %vm1967_vm7, %v1933_v29, %v2001_v46 }
 0x201   : > { %2204 = vst [vmem:[%s3550_s6 + $0x80] sm:$0xf] %v2542_v32  ;;  %v2543_v50 = vpack.c.bf16 %v2035_v37, %v2035_v37 }
 0x203   : > { %v2209_v63 = vsel %vm2207_vm8, %v2543_v50, %v2208_v48 }
 0x204   : > { %2210 = vst [vmem:[%s3550_s6 + $0x84] sm:$0xf] %v2209_v63 }
 0x205 PF: > { %s13_s14 = sadd.s32 1, %s3097_s14   ;;  %s3647_s12 = smov %s3093_s13 }
 0x206   : > { %p10_p5 = scmp.ge.s32.totalorder %s13_s14, 4   ;;  %s3648_s13 = smov %s3650_s15 }
 0x208   :  { %12 = sbr.rel (!%p10_p5) target bundleno = 2 (0x2), region = 71 }

</bundles_post_ra>
